<compile_context>
chip_gen: v7x
topology: tpu7x:2x2x1
jax: 0.10.0
libtpu: 0.0.40
codegen_flags: <defaults>
</compile_context>

<pallas_src>
import functools

import numpy as np
import jax
import jax.numpy as jnp
from jax import lax
from jax.experimental import pallas as pl
from jax.experimental.pallas import tpu as pltpu

LANE = 128
SUBLANE = 8
MAX_TILE_B = 256          # rows per grid step (biggest lane/VMEM-friendly tile)


def _ru(x, m):
    return (x + m - 1) // m * m


def _pad2(a, rows, cols):
    a = jnp.asarray(a, jnp.float32)
    return jnp.pad(a, ((0, rows - a.shape[0]), (0, cols - a.shape[1])))


# --------------------------------------------------------------------------
# Parameter init (mirrors nn.Linear / nn.EmbeddingBag shapes; W stored (in, out))
# --------------------------------------------------------------------------
def _init_linear(key, n, m):
    kw, kb = jax.random.split(key)
    bound = 1.0 / (n ** 0.5)
    w = jax.random.uniform(kw, (n, m), jnp.float32, -bound, bound)
    b = jax.random.uniform(kb, (1, m), jnp.float32, -bound, bound)
    return w, b


def init_dlrm_params(key, m_spa, ln_emb, ln_bot, ln_top):
    n_keys = len(ln_emb) + (len(ln_bot) - 1) + (len(ln_top) - 1)
    keys = list(jax.random.split(key, n_keys))
    params = {"emb": [], "bot": [], "top": []}
    for n in ln_emb:
        bound = 1.0 / (n ** 0.5)
        params["emb"].append(
            jax.random.uniform(keys.pop(0), (n, m_spa), jnp.float32, -bound, bound))
    for i in range(len(ln_bot) - 1):
        params["bot"].append(_init_linear(keys.pop(0), ln_bot[i], ln_bot[i + 1]))
    for i in range(len(ln_top) - 1):
        params["top"].append(_init_linear(keys.pop(0), ln_top[i], ln_top[i + 1]))
    return params


# --------------------------------------------------------------------------
# One-time padding of the parameters to lane-friendly shapes (pad K/N to
# multiples of 128 once at init, not per call).  Also builds the 0/1
# selection tensor that places Z[:, i, j] (j < i) at output lane d_real + p,
# matching the PyTorch li/lj pair ordering.
# --------------------------------------------------------------------------
def prepare_padded_params(params):
    emb_tables = params["emb"]
    bot = params["bot"]
    top = params["top"]
    n_emb = len(emb_tables)
    nf = n_emb + 1
    n_pairs = nf * (nf - 1) // 2

    d_real = int(emb_tables[0].shape[1]) if n_emb else int(bot[-1][0].shape[1])
    emb_pad = _ru(d_real, LANE)
    top_in_real = int(top[0][0].shape[0])
    assert top_in_real == d_real + n_pairs, "arch_interaction_op='dot' shape mismatch"
    top_in_pad = max(_ru(top_in_real, LANE), emb_pad)

    pp = {}
    pp["emb"] = [_pad2(t, _ru(int(t.shape[0]), SUBLANE), emb_pad) for t in emb_tables]

    def pad_layer(w, b, in_pad=None, out_pad=None):
        in_pad = _ru(int(w.shape[0]), LANE) if in_pad is None else in_pad
        out_pad = _ru(int(w.shape[1]), LANE) if out_pad is None else out_pad
        return (_pad2(w, in_pad, out_pad), _pad2(b, 1, out_pad))

    pp["bot"] = []
    for li, (w, b) in enumerate(bot):
        out_pad = emb_pad if li == len(bot) - 1 else None
        pp["bot"].append(pad_layer(w, b, out_pad=out_pad))

    pp["top"] = []
    for li, (w, b) in enumerate(top):
        in_pad = top_in_pad if li == 0 else None
        pp["top"].append(pad_layer(w, b, in_pad=in_pad))

    sel = np.zeros((nf, nf, top_in_pad), np.float32)
    p = 0
    for i in range(nf):
        for j in range(i):                      # PyTorch li/lj ordering
            sel[i, j, d_real + p] = 1.0
            p += 1
    pp["sel"] = jnp.asarray(sel)

    pp["meta"] = dict(n_emb=n_emb, nf=nf, n_pairs=n_pairs, d_real=d_real,
                      emb_pad=emb_pad, top_in_pad=top_in_pad,
                      out_real=int(top[-1][0].shape[1]))
    return pp


# --------------------------------------------------------------------------
# Fused forward kernel: one grid step = one batch tile, fully VMEM resident.
# --------------------------------------------------------------------------
def _dlrm_fused_kernel(*refs, n_emb, n_bot, n_top, d_real, top_in_pad,
                       sigmoid_bot, sigmoid_top, compute_dtype):
    it = iter(refs)
    x_ref = next(it)
    idx_refs = [next(it) for _ in range(n_emb)]
    bot_w = [next(it) for _ in range(n_bot)]
    bot_b = [next(it) for _ in range(n_bot)]
    tbl_refs = [next(it) for _ in range(n_emb)]
    sel_ref = next(it)
    top_w = [next(it) for _ in range(n_top)]
    top_b = [next(it) for _ in range(n_top)]
    o_ref = next(it)
    feat_ref = next(it)                       # VMEM scratch (tile_b, nf, emb_pad)

    cd = compute_dtype

    def dense(h, w_ref, b_ref, use_sigmoid):
        y = jnp.dot(h.astype(cd), w_ref[...].astype(cd),
                    preferred_element_type=jnp.float32) + b_ref[...]
        return jax.nn.sigmoid(y) if use_sigmoid else jnp.maximum(y, 0.0)

    # ---- bottom MLP (MXU, lane-padded weights) ----
    h = x_ref[...]
    for i in range(n_bot):
        h = dense(h, bot_w[i], bot_b[i], i == sigmoid_bot)

    tile_b, emb_pad = h.shape
    # zero the padded lanes of x so they cannot leak into real rows of the
    # first top-MLP weight (those rows hold the interaction-pair weights)
    col = lax.broadcasted_iota(jnp.int32, (tile_b, emb_pad), 1)
    x_feat = jnp.where(col < d_real, h, 0.0)
    feat_ref[:, 0, :] = x_feat

    # ---- EmbeddingBag(mode='sum'): one-hot multiplicity counts x table (MXU).
    # TODO(synk): for production vocabularies keep tables in HBM and replace the
    # counts-matmul with a scalar-prefetched DMA gather; also ragged lS_o
    # offsets are not supported (uniform bag size assumed).
    for k in range(n_emb):
        idx = idx_refs[k][...]                    # (tile_b, bag) int32
        bag = idx.shape[1]
        vocab_pad = tbl_refs[k].shape[0]
        iota_v = lax.broadcasted_iota(jnp.int32, (tile_b, vocab_pad), 1)
        counts = jnp.zeros((tile_b, vocab_pad), cd)
        for l in range(bag):                      # small static bag size
            counts = counts + (idx[:, l:l + 1] == iota_v).astype(cd)
        emb = jnp.dot(counts, tbl_refs[k][...].astype(cd),
                      preferred_element_type=jnp.float32)
        feat_ref[:, k + 1, :] = emb

    # ---- dot interaction on the MXU: one batched contraction ----
    nf = n_emb + 1
    T = feat_ref[...].astype(cd)                  # (tile_b, nf, emb_pad)
    Z = jnp.einsum("bfd,bgd->bfg", T, T,
                   preferred_element_type=jnp.float32)   # (tile_b, nf, nf)

    if top_in_pad > emb_pad:
        z = jnp.concatenate(
            [x_feat, jnp.zeros((tile_b, top_in_pad - emb_pad), jnp.float32)], axis=1)
    else:
        z = x_feat
    # scatter the lower triangle Z[:, i, j] (j < i) into lanes d_real..d_real+np-1
    # via tiny static 0/1-selection matmuls (keeps everything lane-dense).
    for i in range(1, nf):
        z = z + jnp.dot(Z[:, i, :], sel_ref[i], preferred_element_type=jnp.float32)

    # ---- top MLP ----
    for i in range(n_top):
        z = dense(z, top_w[i], top_b[i], i == sigmoid_top)

    o_ref[...] = z.astype(o_ref.dtype)            # lane-dense (tile_b, out_pad) store


# --------------------------------------------------------------------------
# Wrapper: pads the batch, builds the grid + BlockSpecs, slices padding off.
# --------------------------------------------------------------------------
def dlrm_forward(padded_params, dense_x, lS_o, lS_i, *, sigmoid_bot=-1,
                 sigmoid_top=-1, loss_threshold=0.0,
                 compute_dtype=jnp.float32):
    meta = padded_params["meta"]
    n_emb = meta["n_emb"]
    bot = padded_params["bot"]
    top = padded_params["top"]
    tables = padded_params["emb"]
    sel = padded_params["sel"]

    batch = dense_x.shape[0]
    # Big tiles regardless of batch divisibility: pad the batch up to a
    # multiple of tile_b (padded rows are computed but sliced off).
    tile_b = max(SUBLANE, min(MAX_TILE_B, _ru(batch, SUBLANE)))
    b_pad = _ru(batch, tile_b)
    nb = b_pad // tile_b

    d0_pad = int(bot[0][0].shape[0])
    x_p = jnp.pad(dense_x.astype(jnp.float32),
                  ((0, b_pad - batch), (0, d0_pad - dense_x.shape[1])))

    # TODO(synk): ragged EmbeddingBag offsets unsupported; lS_o assumed uniform
    # (arange(batch) * bag_size), matching the benchmark's synthetic inputs.
    idx_p = []
    for k in range(n_emb):
        idx = jnp.asarray(lS_i[k], jnp.int32)
        if idx.ndim == 1:
            bag = idx.shape[0] // batch
            idx = idx.reshape(batch, bag)
        idx_p.append(jnp.pad(idx, ((0, b_pad - batch), (0, 0))))

    out_pad = int(top[-1][0].shape[1])

    operands = [x_p] + idx_p
    in_specs = [pl.BlockSpec((tile_b, d0_pad), lambda i: (i, 0))]
    for k in range(n_emb):
        in_specs.append(pl.BlockSpec((tile_b, int(idx_p[k].shape[1])),
                                     lambda i: (i, 0)))

    def _full_spec(a):
        nd = a.ndim
        return pl.BlockSpec(tuple(a.shape), lambda i, _n=nd: (0,) * _n)

    fixed = []
    for w, _b in bot:
        fixed.append(w)
    for _w, b in bot:
        fixed.append(b)
    for tbl in tables:
        fixed.append(tbl)
    fixed.append(sel)
    for w, _b in top:
        fixed.append(w)
    for _w, b in top:
        fixed.append(b)
    operands += fixed
    in_specs += [_full_spec(a) for a in fixed]

    kernel = functools.partial(
        _dlrm_fused_kernel,
        n_emb=n_emb, n_bot=len(bot), n_top=len(top),
        d_real=meta["d_real"], top_in_pad=meta["top_in_pad"],
        sigmoid_bot=sigmoid_bot, sigmoid_top=sigmoid_top,
        compute_dtype=compute_dtype)

    out_padded = pl.pallas_call(
        kernel,
        out_shape=jax.ShapeDtypeStruct((b_pad, out_pad), jnp.float32),
        grid_spec=pltpu.PrefetchScalarGridSpec(
            num_scalar_prefetch=0,
            grid=(nb,),
            in_specs=in_specs,
            out_specs=pl.BlockSpec((tile_b, out_pad), lambda i: (i, 0)),
            scratch_shapes=[pltpu.VMEM((tile_b, n_emb + 1, meta["emb_pad"]),
                                       jnp.float32)]),
        compiler_params=pltpu.CompilerParams(
            dimension_semantics=("parallel",),
            vmem_limit_bytes=32 * 1024 * 1024),
    )(*operands)

    p = out_padded[:batch, :meta["out_real"]]
    if 0.0 < loss_threshold < 1.0:
        p = jnp.clip(p, loss_threshold, 1.0 - loss_threshold)
    return p


# --------------------------------------------------------------------------
# Pure-JAX reference (mirrors the PyTorch code path) for correctness check.
# --------------------------------------------------------------------------
def dlrm_reference(params, dense_x, lS_i, *, sigmoid_bot, sigmoid_top):
    batch = dense_x.shape[0]
    x = dense_x
    for i, (w, b) in enumerate(params["bot"]):
        x = x @ w + b
        x = jax.nn.sigmoid(x) if i == sigmoid_bot else jnp.maximum(x, 0.0)
    ly = []
    for k, tbl in enumerate(params["emb"]):
        idx = lS_i[k]
        bag = idx.shape[0] // batch
        ly.append(tbl[idx].reshape(batch, bag, -1).sum(axis=1))
    T = jnp.stack([x] + ly, axis=1)
    Z = jnp.einsum("bid,bjd->bij", T, T)
    nf = T.shape[1]
    cols = [x]
    for i in range(nf):
        for j in range(i):
            cols.append(Z[:, i, j][:, None])
    p = jnp.concatenate(cols, axis=1)
    for i, (w, b) in enumerate(params["top"]):
        p = p @ w + b
        p = jax.nn.sigmoid(p) if i == sigmoid_top else jnp.maximum(p, 0.0)
    return p


if __name__ == "__main__":
    # Small DLRM configuration.
    batch = 8
    m_spa = 16                         # embedding dim == ln_bot[-1]
    ln_emb = [60, 80, 100]             # 3 embedding tables
    ln_bot = [13, 64, 16]              # dense features -> 16
    num_feat = 1 + len(ln_emb)
    npairs = num_feat * (num_feat - 1) // 2
    ln_top = [m_spa + npairs, 64, 32, 1]
    sigmoid_bot = -1                   # all ReLU in bottom MLP
    sigmoid_top = len(ln_top) - 2      # sigmoid on last top layer
    bag_size = 3                       # indices per lookup per sample

    key = jax.random.PRNGKey(0)
    k_par, k_x, k_idx = jax.random.split(key, 3)
    params = init_dlrm_params(k_par, m_spa, ln_emb, ln_bot, ln_top)
    padded = prepare_padded_params(params)

    dense_x = jax.random.normal(k_x, (batch, ln_bot[0]), jnp.float32)
    idx_keys = jax.random.split(k_idx, len(ln_emb))
    lS_i = [jax.random.randint(idx_keys[k], (batch * bag_size,), 0, ln_emb[k],
                               dtype=jnp.int32) for k in range(len(ln_emb))]
    lS_o = [jnp.arange(batch, dtype=jnp.int32) * bag_size for _ in range(len(ln_emb))]

    out = dlrm_forward(padded, dense_x, lS_o, lS_i,
                       sigmoid_bot=sigmoid_bot, sigmoid_top=sigmoid_top,
                       loss_threshold=0.0)
    out = jax.block_until_ready(out)

    ref = dlrm_reference(params, dense_x, lS_i,
                         sigmoid_bot=sigmoid_bot, sigmoid_top=sigmoid_top)
    assert out.shape == (batch, 1), out.shape
    assert jnp.allclose(out, ref, rtol=1e-3, atol=1e-3), (out, ref)

    print("KERNEL_OK")
</pallas_src>

<mosaic_0001>
module attributes {stable_mosaic.version = 11 : i64} {
  func.func @_dlrm_fused_kernel(%arg0: i32, %arg1: memref<8x128xf32, #tpu.memory_space<vmem>>, %arg2: memref<8x3xi32, #tpu.memory_space<vmem>>, %arg3: memref<8x3xi32, #tpu.memory_space<vmem>>, %arg4: memref<8x3xi32, #tpu.memory_space<vmem>>, %arg5: memref<128x128xf32, #tpu.memory_space<vmem>>, %arg6: memref<128x128xf32, #tpu.memory_space<vmem>>, %arg7: memref<1x128xf32, #tpu.memory_space<vmem>>, %arg8: memref<1x128xf32, #tpu.memory_space<vmem>>, %arg9: memref<64x128xf32, #tpu.memory_space<vmem>>, %arg10: memref<80x128xf32, #tpu.memory_space<vmem>>, %arg11: memref<104x128xf32, #tpu.memory_space<vmem>>, %arg12: memref<4x4x128xf32, #tpu.memory_space<vmem>>, %arg13: memref<128x128xf32, #tpu.memory_space<vmem>>, %arg14: memref<128x128xf32, #tpu.memory_space<vmem>>, %arg15: memref<128x128xf32, #tpu.memory_space<vmem>>, %arg16: memref<1x128xf32, #tpu.memory_space<vmem>>, %arg17: memref<1x128xf32, #tpu.memory_space<vmem>>, %arg18: memref<1x128xf32, #tpu.memory_space<vmem>>, %arg19: memref<8x128xf32, #tpu.memory_space<vmem>>, %arg20: memref<8x4x128xf32, #tpu.memory_space<vmem>>) attributes {dimension_semantics = [#tpu.dimension_semantics<parallel>], iteration_bounds = array<i64: 1>, scalar_prefetch = 0 : i64, scratch_operands = 1 : i64, tpu.core_type = #tpu.core_type<tc>, window_params = [{transform_indices = @transform_0, window_bounds = array<i64: 8, 128>}, {transform_indices = @transform_1, window_bounds = array<i64: 8, 3>}, {transform_indices = @transform_2, window_bounds = array<i64: 8, 3>}, {transform_indices = @transform_3, window_bounds = array<i64: 8, 3>}, {pipeline_mode = #tpu.pipeline_mode<synchronous>, transform_indices = @transform_4, window_bounds = array<i64: 128, 128>}, {pipeline_mode = #tpu.pipeline_mode<synchronous>, transform_indices = @transform_5, window_bounds = array<i64: 128, 128>}, {pipeline_mode = #tpu.pipeline_mode<synchronous>, transform_indices = @transform_6, window_bounds = array<i64: 1, 128>}, {pipeline_mode = #tpu.pipeline_mode<synchronous>, transform_indices = @transform_7, window_bounds = array<i64: 1, 128>}, {pipeline_mode = #tpu.pipeline_mode<synchronous>, transform_indices = @transform_8, window_bounds = array<i64: 64, 128>}, {pipeline_mode = #tpu.pipeline_mode<synchronous>, transform_indices = @transform_9, window_bounds = array<i64: 80, 128>}, {pipeline_mode = #tpu.pipeline_mode<synchronous>, transform_indices = @transform_10, window_bounds = array<i64: 104, 128>}, {pipeline_mode = #tpu.pipeline_mode<synchronous>, transform_indices = @transform_11, window_bounds = array<i64: 4, 4, 128>}, {pipeline_mode = #tpu.pipeline_mode<synchronous>, transform_indices = @transform_12, window_bounds = array<i64: 128, 128>}, {pipeline_mode = #tpu.pipeline_mode<synchronous>, transform_indices = @transform_13, window_bounds = array<i64: 128, 128>}, {pipeline_mode = #tpu.pipeline_mode<synchronous>, transform_indices = @transform_14, window_bounds = array<i64: 128, 128>}, {pipeline_mode = #tpu.pipeline_mode<synchronous>, transform_indices = @transform_15, window_bounds = array<i64: 1, 128>}, {pipeline_mode = #tpu.pipeline_mode<synchronous>, transform_indices = @transform_16, window_bounds = array<i64: 1, 128>}, {pipeline_mode = #tpu.pipeline_mode<synchronous>, transform_indices = @transform_17, window_bounds = array<i64: 1, 128>}, {transform_indices = @transform_18, window_bounds = array<i64: 8, 128>}]} {
    %c0 = arith.constant 0 : index
    %c0_0 = arith.constant 0 : index
    %0 = vector.load %arg1[%c0, %c0_0] : memref<8x128xf32, #tpu.memory_space<vmem>>, vector<8x128xf32>
    %c0_1 = arith.constant 0 : index
    %c0_2 = arith.constant 0 : index
    %1 = vector.load %arg5[%c0_1, %c0_2] : memref<128x128xf32, #tpu.memory_space<vmem>>, vector<128x128xf32>
    %cst = arith.constant dense<0.000000e+00> : vector<8x128xf32>
    %2 = tpu.matmul %0, %1, %cst {dimension_numbers = #tpu.dot_dimension_numbers<[1], [0], [0], [1], [0, 0, 1, 1], [], []>} : vector<8x128xf32>, vector<128x128xf32>, vector<8x128xf32> -> vector<8x128xf32>
    %c0_3 = arith.constant 0 : index
    %c0_4 = arith.constant 0 : index
    %3 = vector.load %arg7[%c0_3, %c0_4] : memref<1x128xf32, #tpu.memory_space<vmem>>, vector<1x128xf32>
    %4 = vector.broadcast %3 : vector<1x128xf32> to vector<8x128xf32>
    %5 = arith.addf %2, %4 : vector<8x128xf32>
    %cst_5 = arith.constant 0.000000e+00 : f32
    %6 = vector.broadcast %cst_5 : f32 to vector<8x128xf32>
    %7 = arith.maximumf %5, %6 : vector<8x128xf32>
    %c0_6 = arith.constant 0 : index
    %c0_7 = arith.constant 0 : index
    %8 = vector.load %arg6[%c0_6, %c0_7] : memref<128x128xf32, #tpu.memory_space<vmem>>, vector<128x128xf32>
    %cst_8 = arith.constant dense<0.000000e+00> : vector<8x128xf32>
    %9 = tpu.matmul %7, %8, %cst_8 {dimension_numbers = #tpu.dot_dimension_numbers<[1], [0], [0], [1], [0, 0, 1, 1], [], []>} : vector<8x128xf32>, vector<128x128xf32>, vector<8x128xf32> -> vector<8x128xf32>
    %c0_9 = arith.constant 0 : index
    %c0_10 = arith.constant 0 : index
    %10 = vector.load %arg8[%c0_9, %c0_10] : memref<1x128xf32, #tpu.memory_space<vmem>>, vector<1x128xf32>
    %11 = vector.broadcast %10 : vector<1x128xf32> to vector<8x128xf32>
    %12 = arith.addf %9, %11 : vector<8x128xf32>
    %cst_11 = arith.constant 0.000000e+00 : f32
    %13 = vector.broadcast %cst_11 : f32 to vector<8x128xf32>
    %14 = arith.maximumf %12, %13 : vector<8x128xf32>
    %15 = tpu.iota {dimensions = array<i32: 1>} : vector<8x128xi32>
    %c16_i32 = arith.constant 16 : i32
    %16 = vector.broadcast %c16_i32 : i32 to vector<8x128xi32>
    %17 = arith.cmpi slt, %15, %16 : vector<8x128xi32>
    %cst_12 = arith.constant 0.000000e+00 : f32
    %18 = vector.broadcast %cst_12 : f32 to vector<8x128xf32>
    %19 = arith.select %17, %14, %18 : vector<8x128xi1>, vector<8x128xf32>
    %c0_13 = arith.constant 0 : index
    %c0_14 = arith.constant 0 : index
    %c0_15 = arith.constant 0 : index
    %20 = vector.load %arg20[%c0_13, %c0_14, %c0_15] : memref<8x4x128xf32, #tpu.memory_space<vmem>>, vector<8x1x128xf32>
    %21 = vector.shape_cast %20 : vector<8x1x128xf32> to vector<8x128xf32>
    %22 = vector.shape_cast %19 : vector<8x128xf32> to vector<8x1x128xf32>
    tpu.vector_store %arg20[%c0_13, %c0_14, %c0_15], %22 {strides = array<i32>} : memref<8x4x128xf32, #tpu.memory_space<vmem>>, vector<8x1x128xf32>,
    %c0_16 = arith.constant 0 : index
    %c0_17 = arith.constant 0 : index
    %23 = vector.load %arg2[%c0_16, %c0_17] : memref<8x3xi32, #tpu.memory_space<vmem>>, vector<8x3xi32>
    %24 = tpu.iota {dimensions = array<i32: 1>} : vector<8x64xi32>
    %cst_18 = arith.constant 0.000000e+00 : f32
    %25 = vector.broadcast %cst_18 : f32 to vector<8x64xf32>
    %26 = vector.extract_strided_slice %23 {offsets = [0, 0], sizes = [8, 1], strides = [1, 1]} : vector<8x3xi32> to vector<8x1xi32>
    %27 = vector.broadcast %26 : vector<8x1xi32> to vector<8x64xi32>
    %28 = arith.cmpi eq, %27, %24 : vector<8x64xi32>
    %29 = arith.extui %28 : vector<8x64xi1> to vector<8x64xi32>
    %30 = arith.sitofp %29 : vector<8x64xi32> to vector<8x64xf32>
    %31 = arith.addf %25, %30 : vector<8x64xf32>
    %32 = vector.extract_strided_slice %23 {offsets = [0, 1], sizes = [8, 1], strides = [1, 1]} : vector<8x3xi32> to vector<8x1xi32>
    %33 = vector.broadcast %32 : vector<8x1xi32> to vector<8x64xi32>
    %34 = arith.cmpi eq, %33, %24 : vector<8x64xi32>
    %35 = arith.extui %34 : vector<8x64xi1> to vector<8x64xi32>
    %36 = arith.sitofp %35 : vector<8x64xi32> to vector<8x64xf32>
    %37 = arith.addf %31, %36 : vector<8x64xf32>
    %38 = vector.extract_strided_slice %23 {offsets = [0, 2], sizes = [8, 1], strides = [1, 1]} : vector<8x3xi32> to vector<8x1xi32>
    %39 = vector.broadcast %38 : vector<8x1xi32> to vector<8x64xi32>
    %40 = arith.cmpi eq, %39, %24 : vector<8x64xi32>
    %41 = arith.extui %40 : vector<8x64xi1> to vector<8x64xi32>
    %42 = arith.sitofp %41 : vector<8x64xi32> to vector<8x64xf32>
    %43 = arith.addf %37, %42 : vector<8x64xf32>
    %c0_19 = arith.constant 0 : index
    %c0_20 = arith.constant 0 : index
    %44 = vector.load %arg9[%c0_19, %c0_20] : memref<64x128xf32, #tpu.memory_space<vmem>>, vector<64x128xf32>
    %cst_21 = arith.constant dense<0.000000e+00> : vector<8x128xf32>
    %45 = tpu.matmul %43, %44, %cst_21 {dimension_numbers = #tpu.dot_dimension_numbers<[1], [0], [0], [1], [0, 0, 1, 1], [], []>} : vector<8x64xf32>, vector<64x128xf32>, vector<8x128xf32> -> vector<8x128xf32>
    %c0_22 = arith.constant 0 : index
    %c1 = arith.constant 1 : index
    %c0_23 = arith.constant 0 : index
    %46 = vector.load %arg20[%c0_22, %c1, %c0_23] : memref<8x4x128xf32, #tpu.memory_space<vmem>>, vector<8x1x128xf32>
    %47 = vector.shape_cast %46 : vector<8x1x128xf32> to vector<8x128xf32>
    %48 = vector.shape_cast %45 : vector<8x128xf32> to vector<8x1x128xf32>
    tpu.vector_store %arg20[%c0_22, %c1, %c0_23], %48 {strides = array<i32>} : memref<8x4x128xf32, #tpu.memory_space<vmem>>, vector<8x1x128xf32>,
    %c0_24 = arith.constant 0 : index
    %c0_25 = arith.constant 0 : index
    %49 = vector.load %arg3[%c0_24, %c0_25] : memref<8x3xi32, #tpu.memory_space<vmem>>, vector<8x3xi32>
    %50 = tpu.iota {dimensions = array<i32: 1>} : vector<8x80xi32>
    %cst_26 = arith.constant 0.000000e+00 : f32
    %51 = vector.broadcast %cst_26 : f32 to vector<8x80xf32>
    %52 = vector.extract_strided_slice %49 {offsets = [0, 0], sizes = [8, 1], strides = [1, 1]} : vector<8x3xi32> to vector<8x1xi32>
    %53 = vector.broadcast %52 : vector<8x1xi32> to vector<8x80xi32>
    %54 = arith.cmpi eq, %53, %50 : vector<8x80xi32>
    %55 = arith.extui %54 : vector<8x80xi1> to vector<8x80xi32>
    %56 = arith.sitofp %55 : vector<8x80xi32> to vector<8x80xf32>
    %57 = arith.addf %51, %56 : vector<8x80xf32>
    %58 = vector.extract_strided_slice %49 {offsets = [0, 1], sizes = [8, 1], strides = [1, 1]} : vector<8x3xi32> to vector<8x1xi32>
    %59 = vector.broadcast %58 : vector<8x1xi32> to vector<8x80xi32>
    %60 = arith.cmpi eq, %59, %50 : vector<8x80xi32>
    %61 = arith.extui %60 : vector<8x80xi1> to vector<8x80xi32>
    %62 = arith.sitofp %61 : vector<8x80xi32> to vector<8x80xf32>
    %63 = arith.addf %57, %62 : vector<8x80xf32>
    %64 = vector.extract_strided_slice %49 {offsets = [0, 2], sizes = [8, 1], strides = [1, 1]} : vector<8x3xi32> to vector<8x1xi32>
    %65 = vector.broadcast %64 : vector<8x1xi32> to vector<8x80xi32>
    %66 = arith.cmpi eq, %65, %50 : vector<8x80xi32>
    %67 = arith.extui %66 : vector<8x80xi1> to vector<8x80xi32>
    %68 = arith.sitofp %67 : vector<8x80xi32> to vector<8x80xf32>
    %69 = arith.addf %63, %68 : vector<8x80xf32>
    %c0_27 = arith.constant 0 : index
    %c0_28 = arith.constant 0 : index
    %70 = vector.load %arg10[%c0_27, %c0_28] : memref<80x128xf32, #tpu.memory_space<vmem>>, vector<80x128xf32>
    %cst_29 = arith.constant dense<0.000000e+00> : vector<8x128xf32>
    %71 = tpu.matmul %69, %70, %cst_29 {dimension_numbers = #tpu.dot_dimension_numbers<[1], [0], [0], [1], [0, 0, 1, 1], [], []>} : vector<8x80xf32>, vector<80x128xf32>, vector<8x128xf32> -> vector<8x128xf32>
    %c0_30 = arith.constant 0 : index
    %c2 = arith.constant 2 : index
    %c0_31 = arith.constant 0 : index
    %72 = vector.load %arg20[%c0_30, %c2, %c0_31] : memref<8x4x128xf32, #tpu.memory_space<vmem>>, vector<8x1x128xf32>
    %73 = vector.shape_cast %72 : vector<8x1x128xf32> to vector<8x128xf32>
    %74 = vector.shape_cast %71 : vector<8x128xf32> to vector<8x1x128xf32>
    tpu.vector_store %arg20[%c0_30, %c2, %c0_31], %74 {strides = array<i32>} : memref<8x4x128xf32, #tpu.memory_space<vmem>>, vector<8x1x128xf32>,
    %c0_32 = arith.constant 0 : index
    %c0_33 = arith.constant 0 : index
    %75 = vector.load %arg4[%c0_32, %c0_33] : memref<8x3xi32, #tpu.memory_space<vmem>>, vector<8x3xi32>
    %76 = tpu.iota {dimensions = array<i32: 1>} : vector<8x104xi32>
    %cst_34 = arith.constant 0.000000e+00 : f32
    %77 = vector.broadcast %cst_34 : f32 to vector<8x104xf32>
    %78 = vector.extract_strided_slice %75 {offsets = [0, 0], sizes = [8, 1], strides = [1, 1]} : vector<8x3xi32> to vector<8x1xi32>
    %79 = vector.broadcast %78 : vector<8x1xi32> to vector<8x104xi32>
    %80 = arith.cmpi eq, %79, %76 : vector<8x104xi32>
    %81 = arith.extui %80 : vector<8x104xi1> to vector<8x104xi32>
    %82 = arith.sitofp %81 : vector<8x104xi32> to vector<8x104xf32>
    %83 = arith.addf %77, %82 : vector<8x104xf32>
    %84 = vector.extract_strided_slice %75 {offsets = [0, 1], sizes = [8, 1], strides = [1, 1]} : vector<8x3xi32> to vector<8x1xi32>
    %85 = vector.broadcast %84 : vector<8x1xi32> to vector<8x104xi32>
    %86 = arith.cmpi eq, %85, %76 : vector<8x104xi32>
    %87 = arith.extui %86 : vector<8x104xi1> to vector<8x104xi32>
    %88 = arith.sitofp %87 : vector<8x104xi32> to vector<8x104xf32>
    %89 = arith.addf %83, %88 : vector<8x104xf32>
    %90 = vector.extract_strided_slice %75 {offsets = [0, 2], sizes = [8, 1], strides = [1, 1]} : vector<8x3xi32> to vector<8x1xi32>
    %91 = vector.broadcast %90 : vector<8x1xi32> to vector<8x104xi32>
    %92 = arith.cmpi eq, %91, %76 : vector<8x104xi32>
    %93 = arith.extui %92 : vector<8x104xi1> to vector<8x104xi32>
    %94 = arith.sitofp %93 : vector<8x104xi32> to vector<8x104xf32>
    %95 = arith.addf %89, %94 : vector<8x104xf32>
    %c0_35 = arith.constant 0 : index
    %c0_36 = arith.constant 0 : index
    %96 = vector.load %arg11[%c0_35, %c0_36] : memref<104x128xf32, #tpu.memory_space<vmem>>, vector<104x128xf32>
    %cst_37 = arith.constant dense<0.000000e+00> : vector<8x128xf32>
    %97 = tpu.matmul %95, %96, %cst_37 {dimension_numbers = #tpu.dot_dimension_numbers<[1], [0], [0], [1], [0, 0, 1, 1], [], []>} : vector<8x104xf32>, vector<104x128xf32>, vector<8x128xf32> -> vector<8x128xf32>
    %c0_38 = arith.constant 0 : index
    %c3 = arith.constant 3 : index
    %c0_39 = arith.constant 0 : index
    %98 = vector.load %arg20[%c0_38, %c3, %c0_39] : memref<8x4x128xf32, #tpu.memory_space<vmem>>, vector<8x1x128xf32>
    %99 = vector.shape_cast %98 : vector<8x1x128xf32> to vector<8x128xf32>
    %100 = vector.shape_cast %97 : vector<8x128xf32> to vector<8x1x128xf32>
    tpu.vector_store %arg20[%c0_38, %c3, %c0_39], %100 {strides = array<i32>} : memref<8x4x128xf32, #tpu.memory_space<vmem>>, vector<8x1x128xf32>,
    %c0_40 = arith.constant 0 : index
    %c0_41 = arith.constant 0 : index
    %c0_42 = arith.constant 0 : index
    %101 = vector.load %arg20[%c0_40, %c0_41, %c0_42] : memref<8x4x128xf32, #tpu.memory_space<vmem>>, vector<8x4x128xf32>
    "tpu.trace_start"() <{level = 10 : i32, message = "bfd,bgd->bfg"}> : () -> ()
    %cst_43 = arith.constant dense<0.000000e+00> : vector<8x4x4xf32>
    %102 = tpu.matmul %101, %101, %cst_43 {dimension_numbers = #tpu.dot_dimension_numbers<[2], [2], [1], [1], [0, 0, 0, 1, 1, 1], [0], [0]>} : vector<8x4x128xf32>, vector<8x4x128xf32>, vector<8x4x4xf32> -> vector<8x4x4xf32>
    "tpu.trace_stop"() : () -> ()
    %103 = vector.extract_strided_slice %102 {offsets = [0, 1, 0], sizes = [8, 1, 4], strides = [1, 1, 1]} : vector<8x4x4xf32> to vector<8x1x4xf32>
    %104 = vector.shape_cast %103 : vector<8x1x4xf32> to vector<8x4xf32>
    %c1_44 = arith.constant 1 : index
    %c0_45 = arith.constant 0 : index
    %c0_46 = arith.constant 0 : index
    %105 = vector.load %arg12[%c1_44, %c0_45, %c0_46] : memref<4x4x128xf32, #tpu.memory_space<vmem>>, vector<1x4x128xf32>
    %106 = vector.shape_cast %105 : vector<1x4x128xf32> to vector<4x128xf32>
    %cst_47 = arith.constant dense<0.000000e+00> : vector<8x128xf32>
    %107 = tpu.matmul %104, %106, %cst_47 {dimension_numbers = #tpu.dot_dimension_numbers<[1], [0], [0], [1], [0, 0, 1, 1], [], []>} : vector<8x4xf32>, vector<4x128xf32>, vector<8x128xf32> -> vector<8x128xf32>
    %108 = arith.addf %19, %107 : vector<8x128xf32>
    %109 = vector.extract_strided_slice %102 {offsets = [0, 2, 0], sizes = [8, 1, 4], strides = [1, 1, 1]} : vector<8x4x4xf32> to vector<8x1x4xf32>
    %110 = vector.shape_cast %109 : vector<8x1x4xf32> to vector<8x4xf32>
    %c2_48 = arith.constant 2 : index
    %c0_49 = arith.constant 0 : index
    %c0_50 = arith.constant 0 : index
    %111 = vector.load %arg12[%c2_48, %c0_49, %c0_50] : memref<4x4x128xf32, #tpu.memory_space<vmem>>, vector<1x4x128xf32>
    %112 = vector.shape_cast %111 : vector<1x4x128xf32> to vector<4x128xf32>
    %cst_51 = arith.constant dense<0.000000e+00> : vector<8x128xf32>
    %113 = tpu.matmul %110, %112, %cst_51 {dimension_numbers = #tpu.dot_dimension_numbers<[1], [0], [0], [1], [0, 0, 1, 1], [], []>} : vector<8x4xf32>, vector<4x128xf32>, vector<8x128xf32> -> vector<8x128xf32>
    %114 = arith.addf %108, %113 : vector<8x128xf32>
    %115 = vector.extract_strided_slice %102 {offsets = [0, 3, 0], sizes = [8, 1, 4], strides = [1, 1, 1]} : vector<8x4x4xf32> to vector<8x1x4xf32>
    %116 = vector.shape_cast %115 : vector<8x1x4xf32> to vector<8x4xf32>
    %c3_52 = arith.constant 3 : index
    %c0_53 = arith.constant 0 : index
    %c0_54 = arith.constant 0 : index
    %117 = vector.load %arg12[%c3_52, %c0_53, %c0_54] : memref<4x4x128xf32, #tpu.memory_space<vmem>>, vector<1x4x128xf32>
    %118 = vector.shape_cast %117 : vector<1x4x128xf32> to vector<4x128xf32>
    %cst_55 = arith.constant dense<0.000000e+00> : vector<8x128xf32>
    %119 = tpu.matmul %116, %118, %cst_55 {dimension_numbers = #tpu.dot_dimension_numbers<[1], [0], [0], [1], [0, 0, 1, 1], [], []>} : vector<8x4xf32>, vector<4x128xf32>, vector<8x128xf32> -> vector<8x128xf32>
    %120 = arith.addf %114, %119 : vector<8x128xf32>
    %c0_56 = arith.constant 0 : index
    %c0_57 = arith.constant 0 : index
    %121 = vector.load %arg13[%c0_56, %c0_57] : memref<128x128xf32, #tpu.memory_space<vmem>>, vector<128x128xf32>
    %cst_58 = arith.constant dense<0.000000e+00> : vector<8x128xf32>
    %122 = tpu.matmul %120, %121, %cst_58 {dimension_numbers = #tpu.dot_dimension_numbers<[1], [0], [0], [1], [0, 0, 1, 1], [], []>} : vector<8x128xf32>, vector<128x128xf32>, vector<8x128xf32> -> vector<8x128xf32>
    %c0_59 = arith.constant 0 : index
    %c0_60 = arith.constant 0 : index
    %123 = vector.load %arg16[%c0_59, %c0_60] : memref<1x128xf32, #tpu.memory_space<vmem>>, vector<1x128xf32>
    %124 = vector.broadcast %123 : vector<1x128xf32> to vector<8x128xf32>
    %125 = arith.addf %122, %124 : vector<8x128xf32>
    %cst_61 = arith.constant 0.000000e+00 : f32
    %126 = vector.broadcast %cst_61 : f32 to vector<8x128xf32>
    %127 = arith.maximumf %125, %126 : vector<8x128xf32>
    %c0_62 = arith.constant 0 : index
    %c0_63 = arith.constant 0 : index
    %128 = vector.load %arg14[%c0_62, %c0_63] : memref<128x128xf32, #tpu.memory_space<vmem>>, vector<128x128xf32>
    %cst_64 = arith.constant dense<0.000000e+00> : vector<8x128xf32>
    %129 = tpu.matmul %127, %128, %cst_64 {dimension_numbers = #tpu.dot_dimension_numbers<[1], [0], [0], [1], [0, 0, 1, 1], [], []>} : vector<8x128xf32>, vector<128x128xf32>, vector<8x128xf32> -> vector<8x128xf32>
    %c0_65 = arith.constant 0 : index
    %c0_66 = arith.constant 0 : index
    %130 = vector.load %arg17[%c0_65, %c0_66] : memref<1x128xf32, #tpu.memory_space<vmem>>, vector<1x128xf32>
    %131 = vector.broadcast %130 : vector<1x128xf32> to vector<8x128xf32>
    %132 = arith.addf %129, %131 : vector<8x128xf32>
    %cst_67 = arith.constant 0.000000e+00 : f32
    %133 = vector.broadcast %cst_67 : f32 to vector<8x128xf32>
    %134 = arith.maximumf %132, %133 : vector<8x128xf32>
    %c0_68 = arith.constant 0 : index
    %c0_69 = arith.constant 0 : index
    %135 = vector.load %arg15[%c0_68, %c0_69] : memref<128x128xf32, #tpu.memory_space<vmem>>, vector<128x128xf32>
    %cst_70 = arith.constant dense<0.000000e+00> : vector<8x128xf32>
    %136 = tpu.matmul %134, %135, %cst_70 {dimension_numbers = #tpu.dot_dimension_numbers<[1], [0], [0], [1], [0, 0, 1, 1], [], []>} : vector<8x128xf32>, vector<128x128xf32>, vector<8x128xf32> -> vector<8x128xf32>
    %c0_71 = arith.constant 0 : index
    %c0_72 = arith.constant 0 : index
    %137 = vector.load %arg18[%c0_71, %c0_72] : memref<1x128xf32, #tpu.memory_space<vmem>>, vector<1x128xf32>
    %138 = vector.broadcast %137 : vector<1x128xf32> to vector<8x128xf32>
    %139 = arith.addf %136, %138 : vector<8x128xf32>
    %140 = arith.negf %139 : vector<8x128xf32>
    %141 = math.exp %140 : vector<8x128xf32>
    %cst_73 = arith.constant 1.000000e+00 : f32
    %142 = vector.broadcast %cst_73 : f32 to vector<8x128xf32>
    %143 = arith.addf %142, %141 : vector<8x128xf32>
    %144 = arith.divf %142, %143 : vector<8x128xf32>
    %c0_74 = arith.constant 0 : index
    %c0_75 = arith.constant 0 : index
    %145 = vector.load %arg19[%c0_74, %c0_75] : memref<8x128xf32, #tpu.memory_space<vmem>>, vector<8x128xf32>
    tpu.vector_store %arg19[%c0_74, %c0_75], %144 {strides = array<i32>} : memref<8x128xf32, #tpu.memory_space<vmem>>, vector<8x128xf32>,
    return
  }
  func.func @transform_0(%arg0: i32) -> (i32, i32) {
    %c0_i32 = arith.constant 0 : i32
    %c0_i32_0 = arith.constant 0 : i32
    return %arg0, %c0_i32 : i32, i32
  }
  func.func @transform_1(%arg0: i32) -> (i32, i32) {
    %c0_i32 = arith.constant 0 : i32
    %c0_i32_0 = arith.constant 0 : i32
    return %arg0, %c0_i32 : i32, i32
  }
  func.func @transform_2(%arg0: i32) -> (i32, i32) {
    %c0_i32 = arith.constant 0 : i32
    %c0_i32_0 = arith.constant 0 : i32
    return %arg0, %c0_i32 : i32, i32
  }
  func.func @transform_3(%arg0: i32) -> (i32, i32) {
    %c0_i32 = arith.constant 0 : i32
    %c0_i32_0 = arith.constant 0 : i32
    return %arg0, %c0_i32 : i32, i32
  }
  func.func @transform_4(%arg0: i32) -> (i32, i32) {
    %c0_i32 = arith.constant 0 : i32
    %c0_i32_0 = arith.constant 0 : i32
    %c0_i32_1 = arith.constant 0 : i32
    return %c0_i32, %c0_i32_0 : i32, i32
  }
  func.func @transform_5(%arg0: i32) -> (i32, i32) {
    %c0_i32 = arith.constant 0 : i32
    %c0_i32_0 = arith.constant 0 : i32
    %c0_i32_1 = arith.constant 0 : i32
    return %c0_i32, %c0_i32_0 : i32, i32
  }
  func.func @transform_6(%arg0: i32) -> (i32, i32) {
    %c0_i32 = arith.constant 0 : i32
    %c0_i32_0 = arith.constant 0 : i32
    %c0_i32_1 = arith.constant 0 : i32
    return %c0_i32, %c0_i32_0 : i32, i32
  }
  func.func @transform_7(%arg0: i32) -> (i32, i32) {
    %c0_i32 = arith.constant 0 : i32
    %c0_i32_0 = arith.constant 0 : i32
    %c0_i32_1 = arith.constant 0 : i32
    return %c0_i32, %c0_i32_0 : i32, i32
  }
  func.func @transform_8(%arg0: i32) -> (i32, i32) {
    %c0_i32 = arith.constant 0 : i32
    %c0_i32_0 = arith.constant 0 : i32
    %c0_i32_1 = arith.constant 0 : i32
    return %c0_i32, %c0_i32_0 : i32, i32
  }
  func.func @transform_9(%arg0: i32) -> (i32, i32) {
    %c0_i32 = arith.constant 0 : i32
    %c0_i32_0 = arith.constant 0 : i32
    %c0_i32_1 = arith.constant 0 : i32
    return %c0_i32, %c0_i32_0 : i32, i32
  }
  func.func @transform_10(%arg0: i32) -> (i32, i32) {
    %c0_i32 = arith.constant 0 : i32
    %c0_i32_0 = arith.constant 0 : i32
    %c0_i32_1 = arith.constant 0 : i32
    return %c0_i32, %c0_i32_0 : i32, i32
  }
  func.func @transform_11(%arg0: i32) -> (i32, i32, i32) {
    %c0_i32 = arith.constant 0 : i32
    %c0_i32_0 = arith.constant 0 : i32
    %c0_i32_1 = arith.constant 0 : i32
    %c0_i32_2 = arith.constant 0 : i32
    return %c0_i32, %c0_i32_0, %c0_i32_1 : i32, i32, i32
  }
  func.func @transform_12(%arg0: i32) -> (i32, i32) {
    %c0_i32 = arith.constant 0 : i32
    %c0_i32_0 = arith.constant 0 : i32
    %c0_i32_1 = arith.constant 0 : i32
    return %c0_i32, %c0_i32_0 : i32, i32
  }
  func.func @transform_13(%arg0: i32) -> (i32, i32) {
    %c0_i32 = arith.constant 0 : i32
    %c0_i32_0 = arith.constant 0 : i32
    %c0_i32_1 = arith.constant 0 : i32
    return %c0_i32, %c0_i32_0 : i32, i32
  }
  func.func @transform_14(%arg0: i32) -> (i32, i32) {
    %c0_i32 = arith.constant 0 : i32
    %c0_i32_0 = arith.constant 0 : i32
    %c0_i32_1 = arith.constant 0 : i32
    return %c0_i32, %c0_i32_0 : i32, i32
  }
  func.func @transform_15(%arg0: i32) -> (i32, i32) {
    %c0_i32 = arith.constant 0 : i32
    %c0_i32_0 = arith.constant 0 : i32
    %c0_i32_1 = arith.constant 0 : i32
    return %c0_i32, %c0_i32_0 : i32, i32
  }
  func.func @transform_16(%arg0: i32) -> (i32, i32) {
    %c0_i32 = arith.constant 0 : i32
    %c0_i32_0 = arith.constant 0 : i32
    %c0_i32_1 = arith.constant 0 : i32
    return %c0_i32, %c0_i32_0 : i32, i32
  }
  func.func @transform_17(%arg0: i32) -> (i32, i32) {
    %c0_i32 = arith.constant 0 : i32
    %c0_i32_0 = arith.constant 0 : i32
    %c0_i32_1 = arith.constant 0 : i32
    return %c0_i32, %c0_i32_0 : i32, i32
  }
  func.func @transform_18(%arg0: i32) -> (i32, i32) {
    %c0_i32 = arith.constant 0 : i32
    %c0_i32_0 = arith.constant 0 : i32
    return %arg0, %c0_i32 : i32, i32
  }
}

</mosaic_0001>

<bundles_post_ra>
// kernel: tpu_custom_call.1
= control target key start
LH: loop header
LB: loop body
LE: loop exit
PB: predicated region body
PF: predicated region fallthrough
CT: control target
= control target key end

     0   :  { %s3521_s0 = inlined_call_operand.hbm [shape: f32[8,128], index: 0, kind: input, shape index: {}]   ;;  %s3522_s1 = inlined_call_operand.vmem [shape: s32[8,3], index: 1, kind: input, shape index: {}]   ;;  %s3523_s2 = inlined_call_operand.vmem [shape: s32[8,3], index: 2, kind: input, shape index: {}]   ;;  %s3524_s3 = inlined_call_operand.vmem [shape: s32[8,3], index: 3, kind: input, shape index: {}]   ;;  %s3525_s4 = inlined_call_operand.hbm [shape: f32[128,128], index: 4, kind: input, shape index: {}]   ;;  %s3526_s5 = inlined_call_operand.hbm [shape: f32[128,128], index: 5, kind: input, shape index: {}]   ;;  %s3527_s6 = inlined_call_operand.vmem [shape: f32[1,128], index: 6, kind: input, shape index: {}]   ;;  %s3528_s7 = inlined_call_operand.vmem [shape: f32[1,128], index: 7, kind: input, shape index: {}]   ;;  %s3529_s8 = inlined_call_operand.vmem [shape: f32[64,128], index: 8, kind: input, shape index: {}]   ;;  %s3530_s9 = inlined_call_operand.hbm [shape: f32[80,128], index: 9, kind: input, shape index: {}]   ;;  %s3531_s10 = inlined_call_operand.hbm [shape: f32[104,128], index: 10, kind: input, shape index: {}]   ;;  %s3532_s11 = inlined_call_operand.hbm [shape: f32[4,4,128], index: 11, kind: input, shape index: {}]   ;;  %s3533_s12 = inlined_call_operand.hbm [shape: f32[128,128], index: 12, kind: input, shape index: {}]   ;;  %s3534_s13 = inlined_call_operand.hbm [shape: f32[128,128], index: 13, kind: input, shape index: {}]   ;;  %s3535_s14 = inlined_call_operand.hbm [shape: f32[128,128], index: 14, kind: input, shape index: {}]   ;;  %s3536_s15 = inlined_call_operand.vmem [shape: f32[1,128], index: 15, kind: input, shape index: {}]   ;;  %s3537_s16 = inlined_call_operand.vmem [shape: f32[1,128], index: 16, kind: input, shape index: {}]   ;;  %s3538_s17 = inlined_call_operand.vmem [shape: f32[1,128], index: 17, kind: input, shape index: {}]   ;;  %s3539_s18 = inlined_call_operand.hbm [shape: f32[8,128], index: 18, kind: output, shape index: {}]  }
   0x1   :  { %3542 = sst [smem:[#allocation25_spill]] %s3521_s0 }
   0x2   :  { %3543 = sst [smem:[#allocation26_spill]] %s3522_s1 }
   0x3   :  { %3544 = sst [smem:[#allocation27_spill]] %s3523_s2 }
   0x4   :  { %3545 = sst [smem:[#allocation28_spill]] %s3539_s18 }
   0x5   :  { %23 = vsyncpa [#allocation4], 0 }
   0x6   :  { %24 = vsyncpa [#allocation7], 0 }
   0x7   :  { %25 = vsyncpa [#allocation10], 0 }
   0x8   :  { %26 = vsyncpa [#allocation13], 0 }
   0x9   :  { %27 = vsyncpa [#allocation16], 0 }
   0xa   :  { %28 = vsyncpa [#allocation5], 0  ;;  %s3041_s27 = smov [#allocation6]   ;;  %s2809_s0 = scalar_lea.hbm %s3525_s4, 2048 }
   0xb   :  { %s50_s28 = sshll.u32 %s3041_s27, 4  ;;  %p2810_p0 = scmp.ne.s32.totalorder %s3525_s4, %s2809_s0  ;;  %s51_s28 = int_to_ptr.vmem [resolvable:$true] %s50_s28 }
   0xc   :  { %p2813_p1 = scmp.lt.u32.totalorder %s2809_s0, %s3525_s4 }
   0xe   :  { %p2815_p2 = pnand %p2813_p1, %p2810_p0 }
  0x10   :  { %2818 = shalt.err (!%p2815_p2)
}
  0x11   :  { %s2819_s22 = scalar_lea.vmem %s51_s28, 2048  ;;  %p2824_p4 = scmp.lt.s32.totalorder %s51_s28, %s51_s28 }
  0x12   :  { %p2820_p3 = scmp.ne.s32.totalorder %s51_s28, %s2819_s22  ;;  %p2825_p5 = scmp.lt.s32.totalorder %s2819_s22, %s2819_s22 }
  0x14   :  { %p2826_p6 = por %p2825_p5, %p2824_p4 }
  0x16   :  { %p2827_p7 = pnand %p2826_p6, %p2820_p3 }
  0x18   :  { %2830 = shalt.err (!%p2827_p7)
}
  0x19   :  { %s3042_s2 = smov 128   ;;  %s3043_s23 = smov 8  }
  0x1a   :  { %56 = dma.hbm_to_vmem [thread:$0]  %s3525_s4, 2048, %s51_s28, [#allocation7], %s3042_s2, %s3042_s2, %s3043_s23  }
  0x1b   :  { %s3044_s26 = smov [#allocation9]   ;;  %s3045_s29 = smov [#allocation12]  }
  0x1c   :  { %s80_s27 = sshll.u32 %s3044_s26, 4  ;;  %s104_s30 = sshll.u32 %s3045_s29, 4  ;;  %s81_s27 = int_to_ptr.vmem [resolvable:$true] %s80_s27  ;;  %s105_s30 = int_to_ptr.vmem [resolvable:$true] %s104_s30 }
  0x1d   :  { %s2831_s1 = scalar_lea.hbm %s3530_s9, 1280 }
  0x1e   :  { %p2832_p8 = scmp.ne.s32.totalorder %s3530_s9, %s2831_s1  ;;  %p2835_p9 = scmp.lt.u32.totalorder %s2831_s1, %s3530_s9 }
  0x20   :  { %p2837_p10 = pnand %p2835_p9, %p2832_p8 }
  0x22   :  { %2840 = shalt.err (!%p2837_p10)
}
  0x23   :  { %s2841_s4 = scalar_lea.vmem %s81_s27, 1280  ;;  %p2846_p12 = scmp.lt.s32.totalorder %s81_s27, %s81_s27 }
  0x24   :  { %p2842_p11 = scmp.ne.s32.totalorder %s81_s27, %s2841_s4  ;;  %p2847_p13 = scmp.lt.s32.totalorder %s2841_s4, %s2841_s4 }
  0x26   :  { %p2848_p0 = por %p2847_p13, %p2846_p12 }
  0x28   :  { %p2849_p1 = pnand %p2848_p0, %p2842_p11 }
  0x2a   :  { %2852 = shalt.err (!%p2849_p1)
}
  0x2b   :  { %86 = dma.hbm_to_vmem [thread:$0]  %s3530_s9, 1280, %s81_s27, [#allocation10], %s3042_s2, %s3042_s2, %s3043_s23  }
  0x2c   :  { %s2853_s26 = scalar_lea.hbm %s3532_s11, 256 }
  0x2d   :  { %p2854_p2 = scmp.ne.s32.totalorder %s3532_s11, %s2853_s26  ;;  %p2857_p3 = scmp.lt.u32.totalorder %s2853_s26, %s3532_s11 }
  0x2f   :  { %p2859_p4 = pnand %p2857_p3, %p2854_p2 }
  0x31   :  { %2862 = shalt.err (!%p2859_p4)
}
  0x32   :  { %s2863_s20 = scalar_lea.vmem %s105_s30, 256  ;;  %p2868_p6 = scmp.lt.s32.totalorder %s105_s30, %s105_s30 }
  0x33   :  { %p2864_p5 = scmp.ne.s32.totalorder %s105_s30, %s2863_s20  ;;  %p2869_p7 = scmp.lt.s32.totalorder %s2863_s20, %s2863_s20 }
  0x35   :  { %p2870_p8 = por %p2869_p7, %p2868_p6 }
  0x37   :  { %p2871_p9 = pnand %p2870_p8, %p2864_p5 }
  0x39   :  { %2874 = shalt.err (!%p2871_p9)
}
  0x3a   :  { %s3046_s9 = smov 64   ;;  %s3047_s27 = smov 4  }
  0x3b   :  { %110 = dma.hbm_to_vmem [thread:$0]  %s3532_s11, 256, %s105_s30, [#allocation13], %s3046_s9, %s3046_s9, %s3047_s27  }
  0x3c   :  { %s3048_s4 = smov [#allocation15]   ;;  %s3049_s24 = smov [#allocation3]  }
  0x3d   :  { %s128_s28 = sshll.u32 %s3048_s4, 4  ;;  %s35_s25 = sshll.u32 %s3049_s24, 4  ;;  %s129_s28 = int_to_ptr.vmem [resolvable:$true] %s128_s28  ;;  %s36_s25 = int_to_ptr.vmem [resolvable:$true] %s35_s25 }
  0x3e   :  { %s2875_s29 = scalar_lea.hbm %s3534_s13, 2048 }
  0x3f   :  { %p2876_p10 = scmp.ne.s32.totalorder %s3534_s13, %s2875_s29  ;;  %p2879_p11 = scmp.lt.u32.totalorder %s2875_s29, %s3534_s13 }
  0x41   :  { %p2881_p12 = pnand %p2879_p11, %p2876_p10 }
  0x43   :  { %2884 = shalt.err (!%p2881_p12)
}
  0x44   :  { %s2885_s11 = scalar_lea.vmem %s129_s28, 2048  ;;  %p2890_p0 = scmp.lt.s32.totalorder %s129_s28, %s129_s28 }
  0x45   :  { %p2886_p13 = scmp.ne.s32.totalorder %s129_s28, %s2885_s11  ;;  %p2891_p1 = scmp.lt.s32.totalorder %s2885_s11, %s2885_s11 }
  0x47   :  { %p2892_p2 = por %p2891_p1, %p2890_p0 }
  0x49   :  { %p2893_p3 = pnand %p2892_p2, %p2886_p13 }
  0x4b   :  { %2896 = shalt.err (!%p2893_p3)
}
  0x4c   :  { %134 = dma.hbm_to_vmem [thread:$0]  %s3534_s13, 2048, %s129_s28, [#allocation16], %s3042_s2, %s3042_s2, %s3043_s23  }
  0x4d   :  { %s3546_s22 = sld [smem:[#allocation25_spill]] }
  0x53   :  { %s2897_s4 = scalar_lea.hbm %s3546_s22, 128 }
  0x54   :  { %p2898_p4 = scmp.ne.s32.totalorder %s3546_s22, %s2897_s4  ;;  %p2901_p5 = scmp.lt.u32.totalorder %s2897_s4, %s3546_s22 }
  0x56   :  { %p2903_p6 = pnand %p2901_p5, %p2898_p4 }
  0x58   :  { %2906 = shalt.err (!%p2903_p6)
}
  0x59   :  { %s2907_s0 = scalar_lea.vmem %s36_s25, 128  ;;  %p2912_p8 = scmp.lt.s32.totalorder %s36_s25, %s36_s25 }
  0x5a   :  { %p2908_p7 = scmp.ne.s32.totalorder %s36_s25, %s2907_s0  ;;  %p2913_p9 = scmp.lt.s32.totalorder %s2907_s0, %s2907_s0 }
  0x5c   :  { %p2914_p10 = por %p2913_p9, %p2912_p8 }
  0x5e   :  { %p2915_p11 = pnand %p2914_p10, %p2908_p7 }
  0x60   :  { %2918 = shalt.err (!%p2915_p11)
}
  0x61   :  { %38 = dma.hbm_to_vmem [thread:$0]  %s3546_s22, 128, %s36_s25, [#allocation4]  }
  0x62   :  { %s3050_s19 = smov [#allocation8]   ;;  %s3051_s20 = smov [#allocation11]  }
  0x63   :  { %s62_s1 = sshll.u32 %s3050_s19, 4  ;;  %s92_s11 = sshll.u32 %s3051_s20, 4  ;;  %s63_s1 = int_to_ptr.vmem [resolvable:$true] %s62_s1  ;;  %s93_s11 = int_to_ptr.vmem [resolvable:$true] %s92_s11 }
  0x64   :  { %s2919_s27 = scalar_lea.hbm %s3526_s5, 2048 }
  0x65   :  { %p2920_p12 = scmp.ne.s32.totalorder %s3526_s5, %s2919_s27  ;;  %p2923_p13 = scmp.lt.u32.totalorder %s2919_s27, %s3526_s5 }
  0x67   :  { %p2925_p0 = pnand %p2923_p13, %p2920_p12 }
  0x69   :  { %2928 = shalt.err (!%p2925_p0)
}
  0x6a   :  { %s2929_s25 = scalar_lea.vmem %s63_s1, 2048  ;;  %p2934_p2 = scmp.lt.s32.totalorder %s63_s1, %s63_s1 }
  0x6b   :  { %p2930_p1 = scmp.ne.s32.totalorder %s63_s1, %s2929_s25  ;;  %p2935_p3 = scmp.lt.s32.totalorder %s2929_s25, %s2929_s25 }
  0x6d   :  { %p2936_p4 = por %p2935_p3, %p2934_p2 }
  0x6f   :  { %p2937_p5 = pnand %p2936_p4, %p2930_p1 }
  0x71   :  { %2940 = shalt.err (!%p2937_p5)
}
  0x72   :  { %68 = dma.hbm_to_vmem [thread:$0]  %s3526_s5, 2048, %s63_s1, [#allocation7], %s3042_s2, %s3042_s2, %s3043_s23  }
  0x73   :  { %s2941_s13 = scalar_lea.hbm %s3531_s10, 1664 }
  0x74   :  { %p2942_p6 = scmp.ne.s32.totalorder %s3531_s10, %s2941_s13  ;;  %p2945_p7 = scmp.lt.u32.totalorder %s2941_s13, %s3531_s10 }
  0x76   :  { %p2947_p8 = pnand %p2945_p7, %p2942_p6 }
  0x78   :  { %2950 = shalt.err (!%p2947_p8)
}
  0x79   :  { %s2951_s9 = scalar_lea.vmem %s93_s11, 1664  ;;  %p2956_p10 = scmp.lt.s32.totalorder %s93_s11, %s93_s11 }
  0x7a   :  { %p2952_p9 = scmp.ne.s32.totalorder %s93_s11, %s2951_s9  ;;  %p2957_p11 = scmp.lt.s32.totalorder %s2951_s9, %s2951_s9 }
  0x7c   :  { %p2958_p12 = por %p2957_p11, %p2956_p10 }
  0x7e   :  { %p2959_p13 = pnand %p2958_p12, %p2952_p9 }
  0x80   :  { %2962 = shalt.err (!%p2959_p13)
}
  0x81   :  { %98 = dma.hbm_to_vmem [thread:$0]  %s3531_s10, 1664, %s93_s11, [#allocation10], %s3042_s2, %s3042_s2, %s3043_s23  }
  0x82   :  { %s3052_s27 = smov [#allocation14]   ;;  %s3053_s4 = smov [#allocation17]  }
  0x83   :  { %s116_s21 = sshll.u32 %s3052_s27, 4  ;;  %s140_s24 = sshll.u32 %s3053_s4, 4  ;;  %s117_s21 = int_to_ptr.vmem [resolvable:$true] %s116_s21  ;;  %s141_s24 = int_to_ptr.vmem [resolvable:$true] %s140_s24 }
  0x84   :  { %s2963_s22 = scalar_lea.hbm %s3533_s12, 2048 }
  0x85   :  { %p2964_p0 = scmp.ne.s32.totalorder %s3533_s12, %s2963_s22  ;;  %p2967_p1 = scmp.lt.u32.totalorder %s2963_s22, %s3533_s12 }
  0x87   :  { %p2969_p2 = pnand %p2967_p1, %p2964_p0 }
  0x89   :  { %2972 = shalt.err (!%p2969_p2)
}
  0x8a   :  { %s2973_s10 = scalar_lea.vmem %s117_s21, 2048  ;;  %p2978_p4 = scmp.lt.s32.totalorder %s117_s21, %s117_s21 }
  0x8b   :  { %p2974_p3 = scmp.ne.s32.totalorder %s117_s21, %s2973_s10  ;;  %p2979_p5 = scmp.lt.s32.totalorder %s2973_s10, %s2973_s10 }
  0x8d   :  { %p2980_p6 = por %p2979_p5, %p2978_p4 }
  0x8f   :  { %p2981_p7 = pnand %p2980_p6, %p2974_p3 }
  0x91   :  { %2984 = shalt.err (!%p2981_p7)
}
  0x92   :  { %122 = dma.hbm_to_vmem [thread:$0]  %s3533_s12, 2048, %s117_s21, [#allocation13], %s3042_s2, %s3042_s2, %s3043_s23  }
  0x93   :  { %s2985_s30 = scalar_lea.hbm %s3535_s14, 2048 }
  0x94   :  { %p2986_p8 = scmp.ne.s32.totalorder %s3535_s14, %s2985_s30  ;;  %p2989_p9 = scmp.lt.u32.totalorder %s2985_s30, %s3535_s14 }
  0x96   :  { %p2991_p10 = pnand %p2989_p9, %p2986_p8 }
  0x98   :  { %2994 = shalt.err (!%p2991_p10)
}
  0x99   :  { %s2995_s4 = scalar_lea.vmem %s141_s24, 2048  ;;  %p3000_p12 = scmp.lt.s32.totalorder %s141_s24, %s141_s24 }
  0x9a   :  { %p2996_p11 = scmp.ne.s32.totalorder %s141_s24, %s2995_s4  ;;  %p3001_p13 = scmp.lt.s32.totalorder %s2995_s4, %s2995_s4 }
  0x9c   :  { %p3002_p0 = por %p3001_p13, %p3000_p12 }
  0x9e   :  { %p3003_p1 = pnand %p3002_p0, %p2996_p11 }
  0xa0   :  { %3006 = shalt.err (!%p3003_p1)
}
  0xa1   :  { %146 = dma.hbm_to_vmem [thread:$0]  %s3535_s14, 2048, %s141_s24, [#allocation16], %s3042_s2, %s3042_s2, %s3043_s23  }
  0xa2   :  { %3029 = dma.done.wait [#allocation4], 128  }
  0xa3   :  { %3030 = vsyncadd [#allocation4], 4294967168 }
  0xa4   :  { %3031 = dma.done.wait [#allocation7], 4096  }
  0xa5   :  { %3032 = vsyncadd [#allocation7], 4294963200 }
  0xa6   :  { %3033 = dma.done.wait [#allocation10], 2944  }
  0xa7   :  { %3034 = vsyncadd [#allocation10], 4294964352 }
  0xa8   :  { %3035 = dma.done.wait [#allocation13], 2304  }
  0xa9   :  { %3036 = vsyncadd [#allocation13], 4294964992 }
  0xaa   :  { %3037 = dma.done.wait [#allocation16], 4096  }
  0xab   :  { %3038 = vsyncadd [#allocation16], 4294963200  ;;  %v3054_v0 = vmov 0.0|0.0   ;;  %vm3055_vm0 = vmmov 0   ;;  %v3056_v1 = vmov 0.0   ;;  %v3057_v2 = vmov 0  }
  0xac   :  { %2606 = vmatprep.subr.bf16.mxu0 %v3054_v0  ;;  %2337 = vmatprep.mubr.msk.f32.mxu0 %vm3055_vm0, %v3056_v1  ;;  %v3058_v3 = vmov 2   ;;  %v181_v4 = vld [vmem:[#allocation6] sm:$0xff]  ;;  %v182_v5 = vld [vmem:[#allocation6 + $0x8] sm:$0xff]  ;;  %v183_v6 = vld [vmem:[#allocation6 + $0x10] sm:$0xff]  ;;  %s3547_s23 = sld [smem:[#allocation26_spill]]  ;;  %s3548_s25 = sld [smem:[#allocation27_spill]] }
  0xad   :  { %2797 = vset.pattern.permute.xlu0 %v3057_v2  ;;  %2799 = vset.pattern.permute.xlu1 %v3058_v3  ;;  %v2607_v7 = vpack.c.bf16 %v182_v5, %v181_v4  ;;  %v184_v8 = vld [vmem:[#allocation6 + $0x18] sm:$0xff]  ;;  %v185_v10 = vld [vmem:[#allocation6 + $0x20] sm:$0xff]  ;;  %v186_v11 = vld [vmem:[#allocation6 + $0x28] sm:$0xff]  ;;  %v3059_v20 = vmov 1   ;;  %vm469_vm5 = vcmask 523264   ;;  %vm816_vm10 = vcmask 850944  }
  0xae   :  { %2630 = vmatprep.subr.bf16.mxu1 %v3054_v0  ;;  %2372 = vmatprep.mubr.msk.f32.mxu1 %vm3055_vm0, %v3056_v1  ;;  %v2610_v9 = vpack.c.bf16 %v184_v8, %v183_v6  ;;  %v275_v13 = vld [vmem:[#allocation8] sm:$0xff]  ;;  %v2613_v14 = vpack.c.bf16 %v186_v11, %v185_v10  ;;  %v276_v15 = vld [vmem:[#allocation8 + $0x8] sm:$0xff]  ;;  %v187_v16 = vld [vmem:[#allocation6 + $0x30] sm:$0xff]  ;;  %vm641_vm12 = vcmask 654336   ;;  %vm1558_vm14 = vcmask 1043456  }
  0xaf   :  { %2608 = vmatpush3.bf16.msra.mxu0 %v2607_v7  ;;  %v188_v17 = vld [vmem:[#allocation6 + $0x38] sm:$0xff]  ;;  %v2631_v19 = vpack.c.bf16 %v276_v15, %v275_v13  ;;  %v277_v22 = vld [vmem:[#allocation8 + $0x10] sm:$0xff]  ;;  %v189_v24 = vld [vmem:[#allocation6 + $0x40] sm:$0xff]  ;;  %v369_v7 = vlaneseq  ;;  %vm1535_vm15 = vcmask 1041409  }
  0xb0   :  { %2609 = vmatprep.subr.bf16.mxu0 %v3054_v0  ;;  %v2616_v21 = vpack.c.bf16 %v188_v17, %v187_v16  ;;  %v278_v23 = vld [vmem:[#allocation8 + $0x18] sm:$0xff]  ;;  %v190_v25 = vld [vmem:[#allocation6 + $0x48] sm:$0xff]  ;;  %v279_v28 = vld [vmem:[#allocation8 + $0x20] sm:$0xff] }
  0xb1   :  { %2632 = vmatpush3.bf16.msra.mxu1 %v2631_v19  ;;  %v2634_v26 = vpack.c.bf16 %v278_v23, %v277_v22  ;;  %v2619_v27 = vpack.c.bf16 %v190_v25, %v189_v24  ;;  %v280_v29 = vld [vmem:[#allocation8 + $0x28] sm:$0xff]  ;;  %v191_v30 = vld [vmem:[#allocation6 + $0x50] sm:$0xff]  ;;  %v192_v31 = vld [vmem:[#allocation6 + $0x58] sm:$0xff]  ;;  %v3351_v8 = vand.u32 127, %v369_v7 }
  0xb2   :  { %v439_v12 = vld [vmem:[%s3547_s23] sm:$0xff]  ;;  %2633 = vmatprep.subr.bf16.mxu1 %v3054_v0  ;;  %v2637_v33 = vpack.c.bf16 %v280_v29, %v279_v28  ;;  %v2622_v34 = vpack.c.bf16 %v192_v31, %v191_v30  ;;  %v281_v35 = vld [vmem:[#allocation8 + $0x30] sm:$0xff]  ;;  %v193_v37 = vld [vmem:[#allocation6 + $0x60] sm:$0xff] }
  0xb3   :  { %441 = vperm.xlu0 %2797, %v439_v12   ;;  %455 = vperm.xlu1 %2799, %v439_v12   ;;  %v609_v18 = vld [vmem:[%s3548_s25] sm:$0xff]  ;;  %v194_v38 = vld [vmem:[#allocation6 + $0x68] sm:$0xff]  ;;  %v283_v41 = vld [vmem:[#allocation8 + $0x40] sm:$0xff]  ;;  %vm371_vm13 = vcmp.lt.s32.totalorder %v3351_v8, 16  ;;  %s3061_s25 = smov [#allocation18]  }
  0xb4   :  { %2611 = vmatpush3.bf16.msra.mxu0 %v2610_v9  ;;  %v781_v32 = vld [vmem:[%s3524_s3] sm:$0xff]  ;;  %v2625_v40 = vpack.c.bf16 %v194_v38, %v193_v37  ;;  %v284_v42 = vld [vmem:[#allocation8 + $0x48] sm:$0xff]  ;;  %v195_v43 = vld [vmem:[#allocation6 + $0x70] sm:$0xff]  ;;  %s2111_s22 = sshll.u32 %s3061_s25, 4  ;;  %s2112_s22 = int_to_ptr.vmem [resolvable:$true] %s2111_s22 }
  0xb5   :  { %2612 = vmatprep.subr.bf16.mxu0 %v3054_v0  ;;  %2635 = vmatpush3.bf16.msra.mxu1 %v2634_v26  ;;  %v282_v36 = vld [vmem:[#allocation8 + $0x38] sm:$0xff]  ;;  %v2643_v45 = vpack.c.bf16 %v284_v42, %v283_v41  ;;  %v285_v47 = vld [vmem:[#allocation8 + $0x50] sm:$0xff]  ;;  %v462_v50 = vld [vmem:[%s3529_s8 + $0x8] sm:$0xff]  ;;  %p3012_p3 = scmp.lt.s32.totalorder %s2112_s22, %s2112_s22 }
  0xb6   :  { %2636 = vmatprep.subr.bf16.mxu1 %v3054_v0  ;;  %v2640_v39 = vpack.c.bf16 %v282_v36, %v281_v35  ;;  %v196_v44 = vld [vmem:[#allocation6 + $0x78] sm:$0xff]  ;;  %v287_v54 = vld [vmem:[#allocation8 + $0x60] sm:$0xff]  ;;  %v288_v55 = vld [vmem:[#allocation8 + $0x68] sm:$0xff] }
  0xb7   :  { %2798 = vset.pattern.permute.xlu0 %v3059_v20  ;;  %2800 = vset.pattern.permute.xlu1 %v3057_v2  ;;  %v2628_v46 = vpack.c.bf16 %v196_v44, %v195_v43  ;;  %v286_v48 = vld [vmem:[#allocation8 + $0x58] sm:$0xff]  ;;  %v463_v56 = vld [vmem:[%s3529_s8 + $0x10] sm:$0xff]  ;;  %v464_v57 = vld [vmem:[%s3529_s8 + $0x18] sm:$0xff]  ;;  %v2649_v58 = vpack.c.bf16 %v288_v55, %v287_v54 }
  0xb8   :  { %2614 = vmatpush3.bf16.msra.mxu0 %v2613_v14  ;;  %448 = vperm.xlu0 %2798, %v439_v12   ;;  %v461_v49 = vld [vmem:[%s3529_s8] sm:$0xff]  ;;  %v2646_v51 = vpack.c.bf16 %v286_v48, %v285_v47  ;;  %v2658_v59 = vpack.c.bf16 %v464_v57, %v463_v56  ;;  %v466_v61 = vld [vmem:[%s3529_s8 + $0x28] sm:$0xff]  ;;  %v467_v63 = vld [vmem:[%s3529_s8 + $0x30] sm:$0xff] }
  0xb9   :  { %2615 = vmatprep.subr.bf16.mxu0 %v3054_v0  ;;  %611 = vperm.xlu1 %2800, %v609_v18   ;;  %v180_v52 = vld [vmem:[#allocation3] sm:$0xff]  ;;  %v2655_v53 = vpack.c.bf16 %v462_v50, %v461_v49  ;;  %v289_v4 = vld [vmem:[#allocation8 + $0x70] sm:$0xff]  ;;  %v806_v22 = vld [vmem:[#allocation11 + $0x18] sm:$0xff] }
  0xba   :  { %2638 = vmatpush3.bf16.msra.mxu1 %v2637_v33  ;;  %v465_v60 = vld [vmem:[%s3529_s8 + $0x20] sm:$0xff]  ;;  %v803_v13 = vld [vmem:[#allocation11] sm:$0xff]  ;;  %v809_v31 = vld [vmem:[#allocation11 + $0x30] sm:$0xff] }
  0xbb   :  { %2639 = vmatprep.subr.bf16.mxu1 %v3054_v0  ;;  %v2661_v62 = vpack.c.bf16 %v466_v61, %v465_v60  ;;  %v290_v5 = vld [vmem:[#allocation8 + $0x78] sm:$0xff]  ;;  %v807_v28 = vld [vmem:[#allocation11 + $0x20] sm:$0xff]  ;;  %v814_v41 = vld [vmem:[#allocation11 + $0x58] sm:$0xff] }
  0xbc   :  { %2617 = vmatpush3.bf16.msra.mxu0 %v2616_v21  ;;  %2802 = vset.pattern.permute.xlu0 %v3057_v2  ;;  %v468_v2 = vld [vmem:[%s3529_s8 + $0x38] sm:$0xff]  ;;  %v2652_v6 = vpack.c.bf16 %v290_v5, %v289_v4  ;;  %v804_v14 = vld [vmem:[#allocation11 + $0x8] sm:$0xff]  ;;  %v805_v21 = vld [vmem:[#allocation11 + $0x10] sm:$0xff] }
  0xbd   :  { %2618 = vmatprep.subr.bf16.mxu0 %v3054_v0  ;;  %2801 = vset.pattern.permute.xlu1 %v3059_v20  ;;  %v2682_v19 = vpack.c.bf16 %v804_v14, %v803_v13  ;;  %v2685_v25 = vpack.c.bf16 %v806_v22, %v805_v21  ;;  %v808_v29 = vld [vmem:[#allocation11 + $0x28] sm:$0xff]  ;;  %v811_v35 = vld [vmem:[#allocation11 + $0x40] sm:$0xff]  ;;  %v631_v50 = vld [vmem:[#allocation9] sm:$0xff] }
  0xbe   :  { %618 = vperm.xlu1 %2801, %v609_v18   ;;  %783 = vperm.xlu0 %2802, %v781_v32   ;;  %v2688_v30 = vpack.c.bf16 %v808_v29, %v807_v28  ;;  %v812_v36 = vld [vmem:[#allocation11 + $0x48] sm:$0xff]  ;;  %v815_v48 = vld [vmem:[#allocation11 + $0x60] sm:$0xff]  ;;  %v635_v60 = vld [vmem:[#allocation9 + $0x20] sm:$0xff] }
  0xbf   :  { %2641 = vmatpush3.bf16.msra.mxu1 %v2640_v39  ;;  %v2694_v38 = vpack.c.bf16 %v812_v36, %v811_v35  ;;  %v2124_v49 = vld [vmem:[%s3527_s6] ss:$0 sm:$0xff]  ;;  %v633_v57 = vld [vmem:[#allocation9 + $0x10] sm:$0xff]  ;;  %v636_v61 = vld [vmem:[#allocation9 + $0x28] sm:$0xff] }
  0xc0   :  { %2620 = vmatpush3.bf16.msra.mxu0 %v2619_v27  ;;  %2642 = vmatprep.subr.bf16.mxu1 %v3054_v0  ;;  %v639_v5 = vld [vmem:[#allocation9 + $0x40] sm:$0xff] }
  0xc1   :  { %2621 = vmatprep.subr.bf16.mxu0 %v3054_v0 }
  0xc2   :  { %790 = vperm.xlu1 %2801, %v781_v32   ;;  %2804 = vset.pattern.permute.xlu0 %v3058_v3 }
  0xc3   :  { %797 = vperm.xlu0 %2804, %v781_v32   ;;  %2644 = vmatpush3.bf16.msra.mxu1 %v2643_v45  ;;  %v810_v32 = vld [vmem:[#allocation11 + $0x38] sm:$0xff] }
  0xc4   :  { %2623 = vmatpush3.bf16.msra.mxu0 %v2622_v34  ;;  %2645 = vmatprep.subr.bf16.mxu1 %v3054_v0  ;;  %v2691_v34 = vpack.c.bf16 %v810_v32, %v809_v31 }
  0xc5   :  { %2624 = vmatprep.subr.bf16.mxu0 %v3054_v0 }
  0xc6   :  { %2803 = vset.pattern.permute.xlu1 %v3058_v3  ;;  %v2664_v3 = vpack.c.bf16 %v468_v2, %v467_v63  ;;  %v637_v63 = vld [vmem:[#allocation9 + $0x30] sm:$0xff]  ;;  %v638_v2 = vld [vmem:[#allocation9 + $0x38] sm:$0xff] }
  0xc7   :  { %625 = vperm.xlu1 %2803, %v609_v18   ;;  %2647 = vmatpush3.bf16.msra.mxu1 %v2646_v51  ;;  %v632_v51 = vld [vmem:[#allocation9 + $0x8] sm:$0xff]  ;;  %v2676_v4 = vpack.c.bf16 %v638_v2, %v637_v63 }
  0xc8   :  { %2626 = vmatpush3.bf16.msra.mxu0 %v2625_v40  ;;  %2648 = vmatprep.subr.bf16.mxu1 %v3054_v0  ;;  %v813_v40 = vld [vmem:[#allocation11 + $0x50] sm:$0xff]  ;;  %v2667_v55 = vpack.c.bf16 %v632_v51, %v631_v50 }
  0xc9   :  { %2627 = vmatprep.subr.bf16.mxu0 %v3054_v0  ;;  %v2697_v44 = vpack.c.bf16 %v814_v41, %v813_v40 }
  0xcb   :  { %2650 = vmatpush3.bf16.msra.mxu1 %v2649_v58  ;;  %v634_v58 = vld [vmem:[#allocation9 + $0x18] sm:$0xff] }
  0xcc   :  { %2629 = vmatpush3.bf16.msra.mxu0 %v2628_v46  ;;  %2651 = vmatprep.subr.bf16.mxu1 %v3054_v0 }
  0xcd   :  { %2654 = vmatprep.subr.bf16.mxu0 %v3054_v0 }
  0xcf   :  { %2338 = vmatmul.mubr.f32.vlgmr.msra.gmra.mrb[0].mxu0 %v180_v52  ;;  %2653 = vmatpush3.bf16.msra.mxu1 %v2652_v6  ;;  %v640_v6 = vld [vmem:[#allocation9 + $0x48] sm:$0xff] }
  0xd0   :  { %2656 = vmatpush3.bf16.msra.mxu0 %v2655_v53  ;;  %2391 = vmatprep.mubr.msk.f32.mxu0 %vm3055_vm0, %v3056_v1 }
  0xd1   :  { %2657 = vmatprep.subr.bf16.mxu0 %v3054_v0  ;;  %2666 = vmatprep.subr.bf16.mxu1 %v3054_v0 }
  0xd4   :  { %2659 = vmatpush3.bf16.msra.mxu0 %v2658_v59  ;;  %v2670_v59 = vpack.c.bf16 %v634_v58, %v633_v57 }
  0xd5   :  { %2660 = vmatprep.subr.bf16.mxu0 %v3054_v0 }
  0xd8   :  { %2662 = vmatpush3.bf16.msra.mxu0 %v2661_v62  ;;  %v2673_v62 = vpack.c.bf16 %v636_v61, %v635_v60 }
  0xd9   :  { %2663 = vmatprep.subr.bf16.mxu0 %v3054_v0 }
  0xdc   :  { %2665 = vmatpush3.bf16.msra.mxu0 %v2664_v3 }
  0xdd   :  { %2681 = vmatprep.subr.bf16.mxu0 %v3054_v0 }
 0x132   :  { %v442_v9 = vpop.permute.xlu0 %441  ;;  %v456_v10 = vpop.permute.xlu1 %455 }
 0x133   :  { %vm443_vm1 = vcmp.eq.s32.totalorder %v442_v9, %v3351_v8  ;;  %vm457_vm2 = vcmp.eq.s32.totalorder %v456_v10, %v3351_v8  ;;  %v2679_v9 = vpack.c.bf16 %v640_v6, %v639_v5 }
 0x134   :  { %v2130_v11 = vsel %vm443_vm1, 1.0, %v3056_v1  ;;  %v2132_v17 = vsel %vm457_vm2, 1.0, %v3056_v1  ;;  %vm1538_vm1 = vcmask 1042434   ;;  %vm1541_vm2 = vcmask 1043459  }
 0x137   :  { %v449_v12 = vpop.permute.xlu0 %448 }
 0x138   :  { %vm450_vm3 = vcmp.eq.s32.totalorder %v449_v12, %v3351_v8  ;;  %v612_v15 = vpop.permute.xlu1 %611  ;;  %v3060_v12 = vmov 1966171168  }
 0x139   :  { %v2131_v16 = vsel %vm450_vm3, 1.0, %v3056_v1  ;;  %vm613_vm4 = vcmp.eq.s32.totalorder %v612_v15, %v3351_v8  ;;  %v376_v13 = vunpack.c.l.s4 %v3060_v12  ;;  %v379_v15 = vshrl.u32 %v369_v7, 7 }
 0x13a   :  { %v453_v18 = vadd.f32 %v2131_v16, %v2130_v11  ;;  %v2138_v23 = vsel %vm613_vm4, 1.0, %v3056_v1  ;;  %vm1544_vm3 = vcmask 1044484   ;;  %vm1547_vm4 = vcmask 1045509  }
 0x13b   :  { %v377_v14 = vunpack.c.0.s8 %v376_v13 }
 0x13c   :  { %v460_v20 = vadd.f32 %v2132_v17, %v453_v18 }
 0x13d   :  { %v619_v24 = vpop.permute.xlu1 %618  ;;  %v784_v33 = vpop.permute.xlu0 %783  ;;  %v3398_v16 = vsub.s32 %v377_v14, %v379_v15 }
 0x13e   :  { %2392 = vmatmul.mubr.msk.f32.vlgmr.msra.gmra.mrb[2].mxu0 %vm469_vm5, %v460_v20  ;;  %vm620_vm6 = vcmp.eq.s32.totalorder %v619_v24, %v3351_v8  ;;  %vm785_vm8 = vcmp.eq.s32.totalorder %v784_v33, %v3351_v8  ;;  %vm1550_vm5 = vcmask 1046534  }
 0x13f   :  { %2683 = vmatpush3.bf16.msra.mxu0 %v2682_v19  ;;  %v2139_v26 = vsel %vm620_vm6, 1.0, %v3056_v1  ;;  %2443 = vmatprep.mubr.msk.f32.mxu0 %vm3055_vm0, %v3056_v1  ;;  %v2146_v43 = vsel %vm785_vm8, 1.0, %v3056_v1  ;;  %vm1553_vm6 = vcmask 1047559  }
 0x140   :  { %2684 = vmatprep.subr.bf16.mxu0 %v3054_v0  ;;  %v3366_v27 = vadd.f32 %v2139_v26, %v2138_v23 }
 0x141   :  { %v791_v37 = vpop.permute.xlu1 %790 }
 0x142   :  { %vm792_vm7 = vcmp.eq.s32.totalorder %v791_v37, %v3351_v8  ;;  %v798_v39 = vpop.permute.xlu0 %797 }
 0x143   :  { %2686 = vmatpush3.bf16.msra.mxu0 %v2685_v25  ;;  %v2147_v42 = vsel %vm792_vm7, 1.0, %v3056_v1  ;;  %vm799_vm9 = vcmp.eq.s32.totalorder %v798_v39, %v3351_v8  ;;  %vm1555_vm7 = vcmask 31744  }
 0x144   :  { %2687 = vmatprep.subr.bf16.mxu0 %v3054_v0  ;;  %v795_v45 = vadd.f32 %v2147_v42, %v2146_v43  ;;  %v2148_v46 = vsel %vm799_vm9, 1.0, %v3056_v1 }
 0x146   :  { %v802_v47 = vadd.f32 %v2148_v46, %v795_v45  ;;  %v626_v3 = vpop.permute.xlu1 %625  ;;  %v2125_v46 = vld [vmem:[%s3528_s7] ss:$0 sm:$0xff] }
 0x147   :  { %2689 = vmatpush3.bf16.msra.mxu0 %v2688_v30  ;;  %vm627_vm11 = vcmp.eq.s32.totalorder %v626_v3, %v3351_v8 }
 0x148   :  { %2690 = vmatprep.subr.bf16.mxu0 %v3054_v0  ;;  %v2140_v10 = vsel %vm627_vm11, 1.0, %v3056_v1 }
 0x149   :  { %v630_v11 = vadd.f32 %v2140_v10, %v3366_v27 }
 0x14b   :  { %2692 = vmatpush3.bf16.msra.mxu0 %v2691_v34 }
 0x14c   :  { %2693 = vmatprep.subr.bf16.mxu0 %v3054_v0 }
 0x14f   :  { %2695 = vmatpush3.bf16.msra.mxu0 %v2694_v38 }
 0x150   :  { %2696 = vmatprep.subr.bf16.mxu0 %v3054_v0 }
 0x153   :  { %2698 = vmatpush3.bf16.msra.mxu0 %v2697_v44 }
 0x154   :  { %2441 = vmatprep.subr.mxu0 %v3056_v1 }
 0x157   :  { %2442 = vmatpush3.msra.mxu0 %v815_v48 }
 0x158   :  { %2444 = vmatmul.mubr.msk.f32.vlgmr.msra.gmra.mrb[4].mxu0 %vm816_vm10, %v802_v47  ;;  %2446 = vmatprep.subr.mxu0 %v3056_v1 }
 0x159   :  { %2448 = vmatprep.mubr.msk.f32.mxu0 %vm3055_vm0, %v3056_v1 }
 0x1a2   :  { %v270_v52 = vpop.f32.mrb[0].mxu0 }
 0x1a3   :  { %v271_v53 = vadd.f32 %v2124_v49, %v270_v52  ;;  %v2339_v54 = vpop.f32.mrb[1].mxu0 }
 0x1a5   :  { %v274_v56 = vmax.f32 %v271_v53, 0.0 }
 0x1a7   :  { %2373 = vmatmul.mubr.f32.vlgmr.msra.gmra.mrb[0].mxu1 %v274_v56 }
 0x1a8   :  { %2668 = vmatpush3.bf16.msra.mxu1 %v2667_v55  ;;  %2414 = vmatprep.mubr.msk.f32.mxu1 %vm3055_vm0, %v3056_v1 }
 0x1a9   :  { %2669 = vmatprep.subr.bf16.mxu1 %v3054_v0 }
 0x1ac   :  { %2671 = vmatpush3.bf16.msra.mxu1 %v2670_v59 }
 0x1ad   :  { %2672 = vmatprep.subr.bf16.mxu1 %v3054_v0 }
 0x1b0   :  { %2674 = vmatpush3.bf16.msra.mxu1 %v2673_v62 }
 0x1b1   :  { %2675 = vmatprep.subr.bf16.mxu1 %v3054_v0 }
 0x1b4   :  { %2677 = vmatpush3.bf16.msra.mxu1 %v2676_v4 }
 0x1b5   :  { %2678 = vmatprep.subr.bf16.mxu1 %v3054_v0 }
 0x1b8   :  { %2680 = vmatpush3.bf16.msra.mxu1 %v2679_v9 }
 0x1b9   :  { %2461 = vmatprep.subr.mxu1 %v3056_v1 }
 0x1bb   :  { %2415 = vmatmul.mubr.msk.f32.vlgmr.msra.gmra.mrb[2].mxu1 %vm641_vm12, %v630_v11 }
 0x1bc   :  { %2463 = vmatprep.mubr.msk.f32.mxu1 %vm3055_vm0, %v3056_v1 }
 0x211   :  { %v539_v17 = vpop.f32.mrb[2].mxu0 }
 0x212   :  { %v544_v18 = vcombine.high %v539_v17, %v539_v17  ;;  %v551_v19 = vrot.slane %v539_v17, %v3398_v16  ;;  %v2393_v20 = vpop.f32.mrb[3].mxu0 }
 0x214   :  { %v558_v21 = vrot.slane %v544_v18, %v3398_v16  ;;  %v559_v22 = vcombine.high %v551_v19, %v551_v19  ;;  %v567_v23 = vrot.slane %v551_v19, %v3398_v16  ;;  %2134 = vst.sshfl [vmem:[#allocation2 + $0x1] sm:$0x1 pattern:$0x73625140] %v551_v19 }
 0x216   :  { %v560_v24 = vcombine.high %v558_v21, %v558_v21  ;;  %v574_v25 = vrot.slane %v558_v21, %v3398_v16  ;;  %v581_v26 = vrot.slane %v559_v22, %v3398_v16  ;;  %v589_v27 = vcombine.high %v567_v23, %v567_v23  ;;  %2135 = vst.sshfl [vmem:[#allocation2 + $0x5] sm:$0x1 pattern:$0x73625140] %v559_v22 }
 0x217   :  { %2136 = vst.sshfl [vmem:[#allocation2 + $0x11] sm:$0x1 pattern:$0x73625140] %v558_v21 }
 0x218   :  { %v588_v7 = vrot.slane %v560_v24, %v3398_v16  ;;  %v590_v28 = vcombine.high %v574_v25, %v574_v25  ;;  %v591_v29 = vcombine.high %v581_v26, %v581_v26  ;;  %603 = vst [vmem:[#allocation2 + $0x9] sm:$0x1] %v589_v27  ;;  %2137 = vst.sshfl [vmem:[#allocation2 + $0x15] sm:$0x1 pattern:$0x73625140] %v560_v24 }
 0x219   :  { %v1525_v27 = vld [vmem:[#allocation12 + $0x4] sm:$0xf] }
 0x21a   :  { %v592_v30 = vcombine.high %v588_v7, %v588_v7  ;;  %604 = vst [vmem:[#allocation2 + $0xd] sm:$0x1] %v591_v29  ;;  %607 = vst [vmem:[#allocation2 + $0x19] sm:$0x1] %v590_v28  ;;  %v1817_v7 = vld [vmem:[#allocation14] sm:$0xff]  ;;  %v1818_v28 = vld [vmem:[#allocation14 + $0x8] sm:$0xff] }
 0x21b   :  { %v1819_v29 = vld [vmem:[#allocation14 + $0x10] sm:$0xff] }
 0x21c   :  { %608 = vst [vmem:[#allocation2 + $0x1d] sm:$0x1] %v592_v30  ;;  %v2700_v30 = vpack.c.bf16 %v1818_v28, %v1817_v7 }
 0x22b   :  { %v886_v31 = vpop.f32.mrb[4].mxu0 }
 0x22c   :  { %v891_v32 = vcombine.high %v886_v31, %v886_v31  ;;  %v898_v33 = vrot.slane %v886_v31, %v3398_v16  ;;  %v2445_v34 = vpop.f32.mrb[5].mxu0  ;;  %v1820_v31 = vld [vmem:[#allocation14 + $0x18] sm:$0xff] }
 0x22d   :  { %v1822_v34 = vld [vmem:[#allocation14 + $0x28] sm:$0xff] }
 0x22e   :  { %v905_v35 = vrot.slane %v891_v32, %v3398_v16  ;;  %v906_v36 = vcombine.high %v898_v33, %v898_v33  ;;  %v914_v37 = vrot.slane %v898_v33, %v3398_v16  ;;  %2150 = vst.sshfl [vmem:[#allocation2 + $0x3] sm:$0x1 pattern:$0x73625140] %v898_v33  ;;  %v2703_v32 = vpack.c.bf16 %v1820_v31, %v1819_v29  ;;  %v1821_v33 = vld [vmem:[#allocation14 + $0x20] sm:$0xff] }
 0x230   :  { %v907_v38 = vcombine.high %v905_v35, %v905_v35  ;;  %v921_v39 = vrot.slane %v905_v35, %v3398_v16  ;;  %v928_v40 = vrot.slane %v906_v36, %v3398_v16  ;;  %v936_v41 = vcombine.high %v914_v37, %v914_v37  ;;  %2151 = vst.sshfl [vmem:[#allocation2 + $0x7] sm:$0x1 pattern:$0x73625140] %v906_v36  ;;  %v1823_v36 = vld [vmem:[#allocation14 + $0x30] sm:$0xff]  ;;  %v1824_v37 = vld [vmem:[#allocation14 + $0x38] sm:$0xff] }
 0x231   :  { %2152 = vst.sshfl [vmem:[#allocation2 + $0x13] sm:$0x1 pattern:$0x73625140] %v905_v35  ;;  %v2706_v35 = vpack.c.bf16 %v1822_v34, %v1821_v33 }
 0x232   :  { %v935_v42 = vrot.slane %v907_v38, %v3398_v16  ;;  %v937_v43 = vcombine.high %v921_v39, %v921_v39  ;;  %v938_v44 = vcombine.high %v928_v40, %v928_v40  ;;  %950 = vst [vmem:[#allocation2 + $0xb] sm:$0x1] %v936_v41  ;;  %2153 = vst.sshfl [vmem:[#allocation2 + $0x17] sm:$0x1 pattern:$0x73625140] %v907_v38 }
 0x233   :  { %v2709_v38 = vpack.c.bf16 %v1824_v37, %v1823_v36  ;;  %v1825_v39 = vld [vmem:[#allocation14 + $0x40] sm:$0xff]  ;;  %v1826_v40 = vld [vmem:[#allocation14 + $0x48] sm:$0xff] }
 0x234   :  { %v939_v45 = vcombine.high %v935_v42, %v935_v42  ;;  %951 = vst [vmem:[#allocation2 + $0xf] sm:$0x1] %v938_v44  ;;  %954 = vst [vmem:[#allocation2 + $0x1b] sm:$0x1] %v937_v43  ;;  %v2712_v41 = vpack.c.bf16 %v1826_v40, %v1825_v39  ;;  %v1827_v42 = vld [vmem:[#allocation14 + $0x50] sm:$0xff]  ;;  %v1828_v43 = vld [vmem:[#allocation14 + $0x58] sm:$0xff] }
 0x235   :  { %v2715_v44 = vpack.c.bf16 %v1828_v43, %v1827_v42  ;;  %v1634_v42 = vld [vmem:[#allocation12 + $0x8] sm:$0xf] }
 0x236   :  { %955 = vst [vmem:[#allocation2 + $0x1f] sm:$0x1] %v939_v45  ;;  %v1829_v45 = vld [vmem:[#allocation14 + $0x60] sm:$0xff] }
 0x27a   :  { %v364_v47 = vpop.f32.mrb[0].mxu1 }
 0x27b   :  { %v365_v48 = vadd.f32 %v2125_v46, %v364_v47  ;;  %v2374_v49 = vpop.f32.mrb[1].mxu1  ;;  %v1830_v46 = vld [vmem:[#allocation14 + $0x68] sm:$0xff] }
 0x27c   :  { %v2718_v47 = vpack.c.bf16 %v1830_v46, %v1829_v45  ;;  %v1726_v46 = vld [vmem:[#allocation12 + $0xc] sm:$0xf] }
 0x27d   :  { %v368_v50 = vmax.f32 %v365_v48, 0.0 }
 0x27f   :  { %v3416_v51 = vsel %vm371_vm13, %v368_v50, 0.0 }
 0x280   :  { %v374_v52 = vcombine.high %v3416_v51, %v3416_v51  ;;  %v381_v53 = vrot.slane %v3416_v51, %v3398_v16 }
 0x282   :  { %v388_v54 = vrot.slane %v374_v52, %v3398_v16  ;;  %v389_v55 = vcombine.high %v381_v53, %v381_v53  ;;  %v397_v56 = vrot.slane %v381_v53, %v3398_v16  ;;  %2126 = vst.sshfl [vmem:[#allocation2] sm:$0x1 pattern:$0x73625140] %v381_v53 }
 0x284   :  { %v390_v57 = vcombine.high %v388_v54, %v388_v54  ;;  %v404_v58 = vrot.slane %v388_v54, %v3398_v16  ;;  %v411_v8 = vrot.slane %v389_v55, %v3398_v16  ;;  %v419_v59 = vcombine.high %v397_v56, %v397_v56  ;;  %2127 = vst.sshfl [vmem:[#allocation2 + $0x4] sm:$0x1 pattern:$0x73625140] %v389_v55 }
 0x285   :  { %2128 = vst.sshfl [vmem:[#allocation2 + $0x10] sm:$0x1 pattern:$0x73625140] %v388_v54 }
 0x286   :  { %v418_v60 = vrot.slane %v390_v57, %v3398_v16  ;;  %v420_v61 = vcombine.high %v404_v58, %v404_v58  ;;  %v421_v62 = vcombine.high %v411_v8, %v411_v8  ;;  %433 = vst [vmem:[#allocation2 + $0x8] sm:$0x1] %v419_v59  ;;  %2129 = vst.sshfl [vmem:[#allocation2 + $0x14] sm:$0x1 pattern:$0x73625140] %v390_v57 }
 0x288   :  { %v422_v63 = vcombine.high %v418_v60, %v418_v60  ;;  %434 = vst [vmem:[#allocation2 + $0xc] sm:$0x1] %v421_v62  ;;  %437 = vst [vmem:[#allocation2 + $0x18] sm:$0x1] %v420_v61 }
 0x28a   :  { %438 = vst [vmem:[#allocation2 + $0x1c] sm:$0x1] %v422_v63 }
 0x28e   :  { %v711_v2 = vpop.f32.mrb[2].mxu1 }
 0x28f   :  { %v716_v3 = vcombine.high %v711_v2, %v711_v2  ;;  %v723_v4 = vrot.slane %v711_v2, %v3398_v16  ;;  %v2416_v5 = vpop.f32.mrb[3].mxu1 }
 0x291   :  { %v730_v6 = vrot.slane %v716_v3, %v3398_v16  ;;  %v731_v9 = vcombine.high %v723_v4, %v723_v4  ;;  %v739_v10 = vrot.slane %v723_v4, %v3398_v16  ;;  %2142 = vst.sshfl [vmem:[#allocation2 + $0x2] sm:$0x1 pattern:$0x73625140] %v723_v4 }
 0x293   :  { %v732_v11 = vcombine.high %v730_v6, %v730_v6  ;;  %v746_v12 = vrot.slane %v730_v6, %v3398_v16  ;;  %v753_v13 = vrot.slane %v731_v9, %v3398_v16  ;;  %v761_v14 = vcombine.high %v739_v10, %v739_v10  ;;  %2143 = vst.sshfl [vmem:[#allocation2 + $0x6] sm:$0x1 pattern:$0x73625140] %v731_v9 }
 0x294   :  { %2144 = vst.sshfl [vmem:[#allocation2 + $0x12] sm:$0x1 pattern:$0x73625140] %v730_v6 }
 0x295   :  { %v760_v15 = vrot.slane %v732_v11, %v3398_v16  ;;  %v762_v17 = vcombine.high %v746_v12, %v746_v12  ;;  %v763_v18 = vcombine.high %v753_v13, %v753_v13  ;;  %775 = vst [vmem:[#allocation2 + $0xa] sm:$0x1] %v761_v14  ;;  %2145 = vst.sshfl [vmem:[#allocation2 + $0x16] sm:$0x1 pattern:$0x73625140] %v732_v11 }
 0x297   :  { %v764_v19 = vcombine.high %v760_v15, %v760_v15  ;;  %776 = vst [vmem:[#allocation2 + $0xe] sm:$0x1] %v763_v18  ;;  %779 = vst [vmem:[#allocation2 + $0x1a] sm:$0x1] %v762_v17 }
 0x298   :  { %v956_v20 = vld [vmem:[#allocation2] sm:$0xf] }
 0x299   :  { %780 = vst [vmem:[#allocation2 + $0x1e] sm:$0x1] %v764_v19  ;;  %2447 = vmatpush3.xpose.msra.mxu0 %v956_v20 }
 0x29a   :  { %2451 = vmatprep.subr.mxu0 %v3056_v1  ;;  %v957_v21 = vld [vmem:[#allocation2 + $0x4] sm:$0xf] }
 0x29b   :  { %v960_v23 = vld [vmem:[#allocation2 + $0x10] sm:$0xf] }
 0x29c   :  { %2449 = vmatmul.mubr.f32.vlgmr.msra.gmra.mrb[6].mxu0 %v956_v20  ;;  %v958_v16 = vld [vmem:[#allocation2 + $0x8] sm:$0xf]  ;;  %v961_v25 = vld [vmem:[#allocation2 + $0x14] sm:$0xf] }
 0x29d   :  { %2452 = vmatpush3.xpose.msra.mxu0 %v957_v21  ;;  %2453 = vmatprep.mubr.msk.f32.mxu0 %vm3055_vm0, %v3056_v1 }
 0x29e   :  { %v959_v22 = vld [vmem:[#allocation2 + $0xc] sm:$0xf]  ;;  %2456 = vmatprep.subr.mxu0 %v3056_v1  ;;  %v962_v24 = vld [vmem:[#allocation2 + $0x18] sm:$0xf] }
 0x29f   :  { %2462 = vmatpush3.xpose.msra.mxu1 %v959_v22 }
 0x2a0   :  { %2454 = vmatmul.mubr.f32.vlgmr.msra.gmra.mrb[8].mxu0 %v957_v21  ;;  %2466 = vmatprep.subr.mxu1 %v3056_v1  ;;  %v963_v26 = vld [vmem:[#allocation2 + $0x1c] sm:$0xf] }
 0x2a1   :  { %2457 = vmatpush3.xpose.msra.mxu0 %v958_v16  ;;  %2458 = vmatprep.mubr.msk.f32.mxu0 %vm3055_vm0, %v3056_v1 }
 0x2a2   :  { %2464 = vmatmul.mubr.f32.vlgmr.msra.gmra.mrb[4].mxu1 %v959_v22  ;;  %2476 = vmatprep.subr.mxu0 %v3056_v1 }
 0x2a3   :  { %2467 = vmatpush3.xpose.msra.mxu1 %v960_v23  ;;  %2468 = vmatprep.mubr.msk.f32.mxu1 %vm3055_vm0, %v3056_v1 }
 0x2a4   :  { %2459 = vmatmul.mubr.f32.vlgmr.msra.gmra.mrb[10].mxu0 %v958_v16  ;;  %2471 = vmatprep.subr.mxu1 %v3056_v1 }
 0x2a5   :  { %2477 = vmatpush3.xpose.msra.mxu0 %v962_v24  ;;  %2478 = vmatprep.mubr.msk.f32.mxu0 %vm3055_vm0, %v3056_v1 }
 0x2a6   :  { %2469 = vmatmul.mubr.f32.vlgmr.msra.gmra.mrb[6].mxu1 %v960_v23  ;;  %2486 = vmatprep.subr.mxu0 %v3056_v1 }
 0x2a7   :  { %2472 = vmatpush3.xpose.msra.mxu1 %v961_v25  ;;  %2473 = vmatprep.mubr.msk.f32.mxu1 %vm3055_vm0, %v3056_v1 }
 0x2a8   :  { %2479 = vmatmul.mubr.f32.vlgmr.msra.gmra.mrb[12].mxu0 %v962_v24  ;;  %2481 = vmatprep.subr.mxu1 %v3056_v1 }
 0x2a9   :  { %2488 = vmatprep.mubr.msk.f32.mxu0 %vm3055_vm0, %v3056_v1  ;;  %2487 = vmatpush3.msk.msra.mxu0 %vm1558_vm14, %v1525_v27 }
 0x2aa   :  { %2474 = vmatmul.mubr.f32.vlgmr.msra.gmra.mrb[8].mxu1 %v961_v25  ;;  %2491 = vmatprep.subr.mxu0 %v3056_v1 }
 0x2ab   :  { %2482 = vmatpush3.xpose.msra.mxu1 %v963_v26  ;;  %2483 = vmatprep.mubr.msk.f32.mxu1 %vm3055_vm0, %v3056_v1 }
 0x2ac   :  { %2699 = vmatprep.subr.bf16.mxu1 %v3054_v0 }
 0x2ae   :  { %2484 = vmatmul.mubr.f32.vlgmr.msra.gmra.mrb[10].mxu1 %v963_v26 }
 0x2af   :  { %2533 = vmatprep.mubr.msk.f32.mxu1 %vm3055_vm0, %v3056_v1  ;;  %2701 = vmatpush3.bf16.msra.mxu1 %v2700_v30 }
 0x2b0   :  { %2702 = vmatprep.subr.bf16.mxu1 %v3054_v0 }
 0x2b3   :  { %2704 = vmatpush3.bf16.msra.mxu1 %v2703_v32 }
 0x2b4   :  { %2705 = vmatprep.subr.bf16.mxu1 %v3054_v0 }
 0x2b7   :  { %2707 = vmatpush3.bf16.msra.mxu1 %v2706_v35 }
 0x2b8   :  { %2708 = vmatprep.subr.bf16.mxu1 %v3054_v0 }
 0x2bb   :  { %2710 = vmatpush3.bf16.msra.mxu1 %v2709_v38 }
 0x2bc   :  { %2711 = vmatprep.subr.bf16.mxu1 %v3054_v0 }
 0x2bf   :  { %2713 = vmatpush3.bf16.msra.mxu1 %v2712_v41 }
 0x2c0   :  { %2714 = vmatprep.subr.bf16.mxu1 %v3054_v0 }
 0x2c3   :  { %2716 = vmatpush3.bf16.msra.mxu1 %v2715_v44 }
 0x2c4   :  { %2717 = vmatprep.subr.bf16.mxu1 %v3054_v0 }
 0x2c7   :  { %2719 = vmatpush3.bf16.msra.mxu1 %v2718_v47  ;;  %v1831_v47 = vld [vmem:[#allocation14 + $0x70] sm:$0xff] }
 0x2c8   :  { %2720 = vmatprep.subr.bf16.mxu1 %v3054_v0 }
 0x36f   :  { %v1030_v48 = vpop.f32.mrb[6].mxu0 }
 0x370   :  { %v2450_v49 = vpop.f32.mrb[7].mxu0  ;;  %v1534_v50 = vrot.slane %v1030_v48, 1  ;;  %v1635_v52 = vrot.slane %v1030_v48, 2  ;;  %v1727_v54 = vrot.slane %v1030_v48, 3  ;;  %v1832_v48 = vld [vmem:[#allocation14 + $0x78] sm:$0xff] }
 0x371   :  { %v2721_v49 = vpack.c.bf16 %v1832_v48, %v1831_v47  ;;  %v2162_v47 = vld [vmem:[%s3538_s17] ss:$0 sm:$0xff] }
 0x373   :  { %v1100_v53 = vpop.f32.mrb[8].mxu0  ;;  %2722 = vmatpush3.bf16.msra.mxu1 %v2721_v49 }
 0x374   :  { %v1536_v55 = vsel %vm1535_vm15, %v1100_v53, %v1534_v50  ;;  %v1636_v56 = vrot.slane %v1100_v53, 1  ;;  %v1728_v57 = vrot.slane %v1100_v53, 2  ;;  %v2455_v58 = vpop.f32.mrb[9].mxu0  ;;  %2747 = vmatprep.subr.bf16.mxu1 %v3054_v0  ;;  %v1911_v50 = vld [vmem:[#allocation15] sm:$0xff]  ;;  %v1913_v53 = vld [vmem:[#allocation15 + $0x10] sm:$0xff] }
 0x375   :  { %v1240_v8 = vpop.f32.mrb[4].mxu1  ;;  %v1916_v58 = vld [vmem:[#allocation15 + $0x28] sm:$0xff] }
 0x376   :  { %v1729_v59 = vsel %vm1535_vm15, %v1728_v57, %v1727_v54  ;;  %v1639_v60 = vrot.slane %v1240_v8, 7  ;;  %v2465_v61 = vpop.f32.mrb[5].mxu1  ;;  %v1637_v62 = vsel %vm1535_vm15, %v1636_v56, %v1635_v52  ;;  %v1540_v6 = vrot.slane %v1240_v8, 6  ;;  %v1912_v52 = vld [vmem:[#allocation15 + $0x8] sm:$0xff]  ;;  %v1915_v57 = vld [vmem:[#allocation15 + $0x20] sm:$0xff] }
 0x377   :  { %v1170_v63 = vpop.f32.mrb[10].mxu0  ;;  %v2724_v54 = vpack.c.bf16 %v1912_v52, %v1911_v50 }
 0x378   :  { %v1537_v2 = vrot.slane %v1170_v63, 7  ;;  %v1638_v3 = vsel %vm1538_vm1, %v1170_v63, %v1637_v62  ;;  %v1730_v4 = vrot.slane %v1170_v63, 1  ;;  %v2460_v5 = vpop.f32.mrb[11].mxu0  ;;  %v1919_v62 = vld [vmem:[#allocation15 + $0x40] sm:$0xff]  ;;  %v1920_v63 = vld [vmem:[#allocation15 + $0x48] sm:$0xff] }
 0x379   :  { %v1640_v9 = vsel %vm1541_vm2, %v1639_v60, %v1638_v3  ;;  %v1310_v10 = vpop.f32.mrb[6].mxu1  ;;  %v1918_v60 = vld [vmem:[#allocation15 + $0x38] sm:$0xff]  ;;  %v1921_v3 = vld [vmem:[#allocation15 + $0x50] sm:$0xff] }
 0x37a   :  { %v1539_v11 = vsel %vm1538_vm1, %v1537_v2, %v1536_v55  ;;  %v1731_v12 = vsel %vm1538_vm1, %v1730_v4, %v1729_v59  ;;  %v1543_v13 = vrot.slane %v1310_v10, 5  ;;  %v1641_v14 = vrot.slane %v1310_v10, 6  ;;  %v2470_v15 = vpop.f32.mrb[7].mxu1  ;;  %v1914_v55 = vld [vmem:[#allocation15 + $0x18] sm:$0xff]  ;;  %v1917_v59 = vld [vmem:[#allocation15 + $0x30] sm:$0xff] }
 0x37b   :  { %v1542_v17 = vsel %vm1541_vm2, %v1540_v6, %v1539_v11  ;;  %v1732_v18 = vsel %vm1541_vm2, %v1240_v8, %v1731_v12  ;;  %v1733_v19 = vrot.slane %v1310_v10, 7  ;;  %v1450_v20 = vpop.f32.mrb[12].mxu0  ;;  %v2727_v56 = vpack.c.bf16 %v1914_v55, %v1913_v53  ;;  %v1922_v4 = vld [vmem:[#allocation15 + $0x58] sm:$0xff]  ;;  %v1923_v6 = vld [vmem:[#allocation15 + $0x60] sm:$0xff] }
 0x37c   :  { %v1545_v21 = vsel %vm1544_vm3, %v1543_v13, %v1542_v17  ;;  %v1642_v22 = vsel %vm1544_vm3, %v1641_v14, %v1640_v9  ;;  %v2480_v16 = vpop.f32.mrb[13].mxu0  ;;  %v1549_v28 = vrot.slane %v1450_v20, 3  ;;  %v1645_v29 = vrot.slane %v1450_v20, 4  ;;  %v1924_v9 = vld [vmem:[#allocation15 + $0x68] sm:$0xff]  ;;  %v1925_v14 = vld [vmem:[#allocation15 + $0x70] sm:$0xff]  ;;  %v1926_v15 = vld [vmem:[#allocation15 + $0x78] sm:$0xff] }
 0x37d   :  { %v1734_v23 = vsel %vm1544_vm3, %v1733_v19, %v1732_v18  ;;  %v1380_v24 = vpop.f32.mrb[8].mxu1  ;;  %v1737_v30 = vrot.slane %v1450_v20, 5  ;;  %v2730_v8 = vpack.c.bf16 %v1916_v58, %v1915_v57  ;;  %v2733_v61 = vpack.c.bf16 %v1918_v60, %v1917_v59  ;;  %v2005_v18 = vld [vmem:[#allocation17] sm:$0xff]  ;;  %v2006_v19 = vld [vmem:[#allocation17 + $0x8] sm:$0xff]  ;;  %v2007_v20 = vld [vmem:[#allocation17 + $0x10] sm:$0xff] }
 0x37e   :  { %v1546_v25 = vrot.slane %v1380_v24, 4  ;;  %v1643_v26 = vrot.slane %v1380_v24, 5  ;;  %v1735_v27 = vrot.slane %v1380_v24, 6  ;;  %v2475_v7 = vpop.f32.mrb[9].mxu1  ;;  %v2736_v2 = vpack.c.bf16 %v1920_v63, %v1919_v62 }
 0x37f   :  { %v2739_v5 = vpack.c.bf16 %v1922_v4, %v1921_v3  ;;  %v2742_v10 = vpack.c.bf16 %v1924_v9, %v1923_v6  ;;  %v2745_v17 = vpack.c.bf16 %v1926_v15, %v1925_v14  ;;  %v2014_v7 = vld [vmem:[#allocation17 + $0x48] sm:$0xff] }
 0x380   :  { %v1548_v31 = vsel %vm1547_vm4, %v1546_v25, %v1545_v21  ;;  %v1644_v32 = vsel %vm1547_vm4, %v1643_v26, %v1642_v22  ;;  %v1736_v33 = vsel %vm1547_vm4, %v1735_v27, %v1734_v23  ;;  %v2748_v21 = vpack.c.bf16 %v2006_v19, %v2005_v18  ;;  %v2008_v22 = vld [vmem:[#allocation17 + $0x18] sm:$0xff]  ;;  %v2009_v23 = vld [vmem:[#allocation17 + $0x20] sm:$0xff] }
 0x381   :  { %v1520_v34 = vpop.f32.mrb[10].mxu1  ;;  %v1551_v35 = vsel %vm1550_vm5, %v1549_v28, %v1548_v31  ;;  %v1646_v36 = vsel %vm1550_vm5, %v1645_v29, %v1644_v32  ;;  %v1738_v37 = vsel %vm1550_vm5, %v1737_v30, %v1736_v33  ;;  %v2751_v16 = vpack.c.bf16 %v2008_v22, %v2007_v20  ;;  %v2012_v25 = vld [vmem:[#allocation17 + $0x38] sm:$0xff]  ;;  %v2013_v27 = vld [vmem:[#allocation17 + $0x40] sm:$0xff]  ;;  %v2015_v29 = vld [vmem:[#allocation17 + $0x50] sm:$0xff] }
 0x382   :  { %v1552_v38 = vrot.slane %v1520_v34, 2  ;;  %v1647_v39 = vrot.slane %v1520_v34, 3  ;;  %v1739_v40 = vrot.slane %v1520_v34, 4  ;;  %v2485_v41 = vpop.f32.mrb[11].mxu1  ;;  %v2760_v28 = vpack.c.bf16 %v2014_v7, %v2013_v27  ;;  %v2016_v30 = vld [vmem:[#allocation17 + $0x58] sm:$0xff]  ;;  %v2017_v32 = vld [vmem:[#allocation17 + $0x60] sm:$0xff] }
 0x383   :  { %v2763_v31 = vpack.c.bf16 %v2016_v30, %v2015_v29  ;;  %v2018_v33 = vld [vmem:[#allocation17 + $0x68] sm:$0xff]  ;;  %v2020_v41 = vld [vmem:[#allocation17 + $0x78] sm:$0xff] }
 0x384   :  { %v1554_v43 = vsel %vm1553_vm6, %v1552_v38, %v1551_v35  ;;  %v1648_v44 = vsel %vm1553_vm6, %v1647_v39, %v1646_v36  ;;  %v1740_v45 = vsel %vm1553_vm6, %v1739_v40, %v1738_v37  ;;  %v2766_v34 = vpack.c.bf16 %v2018_v33, %v2017_v32  ;;  %v2160_v35 = vld [vmem:[%s3536_s15] ss:$0 sm:$0xff] }
 0x385   :  { %2489 = vmatmul.mubr.msk.f32.vlgmr.msra.gmra.mrb[14].mxu0 %vm1555_vm7, %v1554_v43  ;;  %v2019_v40 = vld [vmem:[#allocation17 + $0x70] sm:$0xff] }
 0x386   :  { %2492 = vmatpush3.msk.msra.mxu0 %vm1558_vm14, %v1634_v42  ;;  %2493 = vmatprep.mubr.msk.f32.mxu0 %vm3055_vm0, %v3056_v1  ;;  %v2769_v42 = vpack.c.bf16 %v2020_v41, %v2019_v40  ;;  %v2161_v43 = vld [vmem:[%s3537_s16] ss:$0 sm:$0xff]  ;;  %s3007_s16 = scalar_lea.vmem %s2112_s22, 128 }
 0x387   :  { %2496 = vmatprep.subr.mxu0 %v3056_v1  ;;  %p3008_p2 = scmp.ne.s32.totalorder %s2112_s22, %s3007_s16  ;;  %p3013_p4 = scmp.lt.s32.totalorder %s3007_s16, %s3007_s16 }
 0x389   :  { %p3014_p5 = por %p3013_p4, %p3012_p3 }
 0x38b   :  { %p3015_p6 = pnand %p3014_p5, %p3008_p2 }
 0x38d   :  { %2494 = vmatmul.mubr.msk.f32.vlgmr.msra.gmra.mrb[14].mxu0 %vm1555_vm7, %v1648_v44 }
 0x38e   :  { %2497 = vmatpush3.msk.msra.mxu0 %vm1558_vm14, %v1726_v46  ;;  %2498 = vmatprep.mubr.msk.f32.mxu0 %vm3055_vm0, %v3056_v1 }
 0x38f   :  { %2723 = vmatprep.subr.bf16.mxu0 %v3054_v0 }
 0x395   :  { %2499 = vmatmul.mubr.msk.f32.vlgmr.msra.gmra.mrb[14].mxu0 %vm1555_vm7, %v1740_v45 }
 0x396   :  { %2568 = vmatprep.mubr.msk.f32.mxu0 %vm3055_vm0, %v3056_v1  ;;  %2725 = vmatpush3.bf16.msra.mxu0 %v2724_v54 }
 0x397   :  { %2726 = vmatprep.subr.bf16.mxu0 %v3054_v0 }
 0x39a   :  { %2728 = vmatpush3.bf16.msra.mxu0 %v2727_v56 }
 0x39b   :  { %2729 = vmatprep.subr.bf16.mxu0 %v3054_v0 }
 0x39e   :  { %2731 = vmatpush3.bf16.msra.mxu0 %v2730_v8 }
 0x39f   :  { %2732 = vmatprep.subr.bf16.mxu0 %v3054_v0 }
 0x3a2   :  { %2734 = vmatpush3.bf16.msra.mxu0 %v2733_v61 }
 0x3a3   :  { %2735 = vmatprep.subr.bf16.mxu0 %v3054_v0 }
 0x3a6   :  { %2737 = vmatpush3.bf16.msra.mxu0 %v2736_v2 }
 0x3a7   :  { %2738 = vmatprep.subr.bf16.mxu0 %v3054_v0 }
 0x3aa   :  { %2740 = vmatpush3.bf16.msra.mxu0 %v2739_v5 }
 0x3ab   :  { %2741 = vmatprep.subr.bf16.mxu0 %v3054_v0 }
 0x3ae   :  { %2743 = vmatpush3.bf16.msra.mxu0 %v2742_v10 }
 0x3af   :  { %2744 = vmatprep.subr.bf16.mxu0 %v3054_v0 }
 0x3b2   :  { %2746 = vmatpush3.bf16.msra.mxu0 %v2745_v17 }
 0x468   :  { %v1812_v11 = vpop.f32.mrb[14].mxu0 }
 0x469   :  { %v2771_v12 = vadd.f32 %v1812_v11, %v3416_v51  ;;  %v2500_v13 = vpop.f32.mrb[15].mxu0  ;;  %v2010_v51 = vld [vmem:[#allocation17 + $0x28] sm:$0xff] }
 0x46a   :  { %v2754_v24 = vpack.c.bf16 %v2010_v51, %v2009_v23 }
 0x46b   :  { %2534 = vmatmul.mubr.f32.vlgmr.msra.gmra.mrb[12].mxu1 %v2771_v12 }
 0x46c   :  { %2603 = vmatprep.mubr.msk.f32.mxu1 %vm3055_vm0, %v3056_v1  ;;  %2749 = vmatpush3.bf16.msra.mxu1 %v2748_v21  ;;  %v2011_v1 = vld [vmem:[#allocation17 + $0x30] sm:$0xff] }
 0x46d   :  { %2750 = vmatprep.subr.bf16.mxu1 %v3054_v0  ;;  %v2757_v26 = vpack.c.bf16 %v2012_v25, %v2011_v1 }
 0x470   :  { %2752 = vmatpush3.bf16.msra.mxu1 %v2751_v16 }
 0x471   :  { %2753 = vmatprep.subr.bf16.mxu1 %v3054_v0 }
 0x474   :  { %2755 = vmatpush3.bf16.msra.mxu1 %v2754_v24 }
 0x475   :  { %2756 = vmatprep.subr.bf16.mxu1 %v3054_v0 }
 0x478   :  { %2758 = vmatpush3.bf16.msra.mxu1 %v2757_v26 }
 0x479   :  { %2759 = vmatprep.subr.bf16.mxu1 %v3054_v0 }
 0x47c   :  { %2761 = vmatpush3.bf16.msra.mxu1 %v2760_v28 }
 0x47d   :  { %2762 = vmatprep.subr.bf16.mxu1 %v3054_v0 }
 0x480   :  { %2764 = vmatpush3.bf16.msra.mxu1 %v2763_v31 }
 0x481   :  { %2765 = vmatprep.subr.bf16.mxu1 %v3054_v0 }
 0x484   :  { %2767 = vmatpush3.bf16.msra.mxu1 %v2766_v34 }
 0x485   :  { %2768 = vmatprep.subr.bf16.mxu1 %v3054_v0 }
 0x488   :  { %2770 = vmatpush3.bf16.msra.mxu1 %v2769_v42 }
 0x53e   :  { %v1906_v36 = vpop.f32.mrb[12].mxu1 }
 0x53f   :  { %v1907_v37 = vadd.f32 %v2160_v35, %v1906_v36  ;;  %v2535_v38 = vpop.f32.mrb[13].mxu1 }
 0x541   :  { %v1910_v39 = vmax.f32 %v1907_v37, 0.0 }
 0x543   :  { %2569 = vmatmul.mubr.f32.vlgmr.msra.gmra.mrb[16].mxu0 %v1910_v39 }
 0x616   :  { %v2000_v44 = vpop.f32.mrb[16].mxu0 }
 0x617   :  { %v2001_v45 = vadd.f32 %v2161_v43, %v2000_v44  ;;  %v2570_v0 = vpop.f32.mrb[17].mxu0 }
 0x619   :  { %v2004_v46 = vmax.f32 %v2001_v45, 0.0 }
 0x61b   :  { %2604 = vmatmul.mubr.f32.vlgmr.msra.gmra.mrb[14].mxu1 %v2004_v46 }
 0x6ee   :  { %v2094_v48 = vpop.f32.mrb[14].mxu1 }
 0x6ef   :  { %v2095_v49 = vadd.f32 %v2162_v47, %v2094_v48  ;;  %v2605_v50 = vpop.f32.mrb[15].mxu1 }
 0x6f1   :  { %v2163_v52 = vmul.f32 -1.442695, %v2095_v49 }
 0x6f3   :  { %2805 = vpow2.f32 %v2163_v52 }
 0x6fd   :  { %v2806_v53 = vpop.eup %2805 }
 0x6fe   :  { %v2101_v54 = vadd.f32 1.0, %v2806_v53 }
 0x700   :  { %2807 = vrcp.f32 %v2101_v54 }
 0x70a   :  { %v2808_v55 = vpop.eup %2807 }
 0x70b   :  { %2104 = vst [vmem:[#allocation18] sm:$0xff] %v2808_v55 }
 0x70c   :  { %3018 = shalt.err (!%p3015_p6)
}
 0x70d   :  { %s3549_s3 = sld [smem:[#allocation28_spill]] }
 0x713   :  { %s3019_s29 = scalar_lea.hbm %s3549_s3, 128 }
 0x714   :  { %p3020_p7 = scmp.ne.s32.totalorder %s3549_s3, %s3019_s29  ;;  %p3023_p8 = scmp.lt.u32.totalorder %s3019_s29, %s3549_s3 }
 0x716   :  { %p3025_p9 = pnand %p3023_p8, %p3020_p7 }
 0x718   :  { %3028 = shalt.err (!%p3025_p9)
}
 0x719   :  { %2114 = dma.vmem_to_hbm [thread:$0]  %s2112_s22, 128, %s3549_s3, [#allocation5]  }
 0x71a   :  { %3039 = dma.done.wait [#allocation5], 128  }
 0x71b   :  { %3040 = vsyncadd [#allocation5], 4294967168 }
 0x71c   :  { %2118 = vsyncpa [#allocation4], 1 }
 0x71d   :  { %2119 = vsyncpa [#allocation7], 1 }
 0x71e   :  { %2120 = vsyncpa [#allocation10], 1 }
 0x71f   :  { %2121 = vsyncpa [#allocation13], 1 }
 0x720   :  { %2122 = vsyncpa [#allocation16], 1 }
 0x721   :  { %2123 = vsyncpa [#allocation5], 1 }

</bundles_post_ra>
